<compile_context>
chip_gen: v6e
topology: v6e:2x2x1
jax: 0.10.0
libtpu: 0.0.40
codegen_flags: <defaults>
</compile_context>

<pallas_src>
import functools

import jax
import jax.numpy as jnp
from jax import lax
from jax.experimental import pallas as pl
from jax.experimental.pallas import tpu as pltpu


def _round_up(x, m):
    return (x + m - 1) // m * m


def _cdiv(a, b):
    return (a + b - 1) // b


def _vmem_capacity_bytes():
    try:
        info = pltpu.get_tpu_info()
        cap = getattr(info, "vmem_capacity_bytes", None)
        if cap:
            return int(cap)
    except Exception:
        pass
    return 64 << 20  # conservative default (v7x per-TensorCore VMEM)


# ---------------------------------------------------------------------------
# Shared per-tile body: hyperbolic distance + class-weighted CE.
# Channels live on sublanes, pixels on lanes.  Pad lanes (beyond HW) are
# sanitized to 0 and excluded from the per-tile min/max.
# ---------------------------------------------------------------------------
def _tile_body(x_ref, gt_ref, cw_ref, j, *, c, ignore_index, num_classes, hw,
               tile, has_pad):
    x = x_ref[0].astype(jnp.float32)          # (C, T) logits
    gt = gt_ref[0]                            # (1, T) int32 labels
    cw = cw_ref[...]                          # (C, 1) class weights
    C, T = x.shape

    # Softmax pieces over the channel (sublane) axis.
    m = jnp.max(x, axis=0, keepdims=True)                         # (1, T)
    xm = x - m                                                     # (C, T)
    ex = jnp.exp(xm)                                               # (C, T)
    s = jnp.sum(ex, axis=0, keepdims=True)                         # (1, T)
    log_s = jnp.log(s)                                             # (1, T)

    # ||softmax(x)|| = sqrt(sum(ex^2)) / s  (one divide per pixel).
    nrm = jnp.sqrt(jnp.sum(ex * ex, axis=0, keepdims=True)) / s    # (1, T)

    # Hyperbolic distance to origin: 2/sqrt(c) * artanh(sqrt(c) * ||p||).
    sqrt_c = float(c) ** 0.5
    z = jnp.minimum(sqrt_c * nrm, 1.0 - 2.0 ** -20)  # f32-representable clamp
    dist = (1.0 / sqrt_c) * jnp.log((1.0 + z) / (1.0 - z))         # (1, T)

    # Class-weighted CE with two channel reductions instead of full-(C,T)
    # log_s / cw broadcasts (saves VPU passes; extra reduce lands on XLU).
    cls = lax.broadcasted_iota(jnp.int32, (C, T), 0)
    onehot = gt == cls                                             # (C, T)
    x_sel = jnp.sum(jnp.where(onehot, xm, 0.0), axis=0, keepdims=True)
    w_pix = jnp.sum(jnp.where(onehot, cw, 0.0), axis=0, keepdims=True)
    ce = -w_pix * (x_sel - log_s)                                  # (1, T)
    # gt outside [0, C) never matches -> w_pix == 0 -> ce == 0, which already
    # implements ignore_index whenever ignore_index >= num_classes.
    if 0 <= ignore_index < num_classes:
        ce = jnp.where(gt == ignore_index, 0.0, ce)

    if has_pad:
        idx = j * tile + lax.broadcasted_iota(jnp.int32, (1, T), 1)
        inb = idx < hw
        tmin = jnp.min(jnp.where(inb, dist, jnp.inf), axis=1, keepdims=True)
        tmax = jnp.max(jnp.where(inb, dist, -jnp.inf), axis=1, keepdims=True)
        dist = jnp.where(inb, dist, 0.0)   # sanitize OOB garbage (NaN-safe)
        ce = jnp.where(inb, ce, 0.0)
    else:
        tmin = jnp.min(dist, axis=1, keepdims=True)
        tmax = jnp.max(dist, axis=1, keepdims=True)
    return dist, ce, tmin, tmax


# ---------------------------------------------------------------------------
# Fused single-pass kernel: dist/ce live in a VMEM scratch, threshold +
# hyperbolic weights + weighted sum happen at the last HW tile.
# ---------------------------------------------------------------------------
def _fused_kernel(x_ref, gt_ref, cw_ref, out_ref, dist_sc, ce_sc, dmin_sc,
                  dmax_sc, *, c, ignore_index, num_classes, hw, tile, has_pad,
                  num_tiles, t, hr, approx):
    j = pl.program_id(1)

    dist, ce, tmin, tmax = _tile_body(
        x_ref, gt_ref, cw_ref, j, c=c, ignore_index=ignore_index,
        num_classes=num_classes, hw=hw, tile=tile, has_pad=has_pad)

    # Keep per-pixel intermediates VMEM-resident (no HBM round trip).
    dist_sc[j] = dist
    ce_sc[j] = ce

    @pl.when(j == 0)
    def _():
        out_ref[...] = jnp.zeros((1, 1, 1), jnp.float32)
        dmin_sc[...] = jnp.full((1, 1), jnp.inf, jnp.float32)
        dmax_sc[...] = jnp.full((1, 1), -jnp.inf, jnp.float32)

    dmin_sc[...] = jnp.minimum(dmin_sc[...], tmin)
    dmax_sc[...] = jnp.maximum(dmax_sc[...], tmax)

    @pl.when(j == num_tiles - 1)
    def _():
        dmin = dmin_sc[...]                      # (1, 1)
        dmax = dmax_sc[...]                      # (1, 1)
        thresh = dmin + (dmax - dmin) * hr       # (1, 1)
        inv_dmax = 1.0 / dmax                    # (1, 1)

        def body(i, acc):
            d = dist_sc[i]                       # (1, tile)
            w = jnp.log(t + d * inv_dmax)
            w = pl.reciprocal(w, approx=True) if approx else 1.0 / w
            w = jnp.where(d <= thresh, w, 0.0)
            return acc + w * ce_sc[i]            # elementwise accumulate only

        acc = lax.fori_loop(0, num_tiles, body,
                            jnp.zeros((1, tile), jnp.float32))
        out_ref[...] = jnp.sum(acc).reshape(1, 1, 1)


# ---------------------------------------------------------------------------
# Two-pass fallback (very large HW): pass 1 = dist/ce + per-image dmin/dmax.
# ---------------------------------------------------------------------------
def _pass1_kernel(x_ref, gt_ref, cw_ref, dist_ref, ce_ref, dmin_ref, dmax_ref,
                  *, c, ignore_index, num_classes, hw, tile, has_pad):
    j = pl.program_id(1)

    dist, ce, tmin, tmax = _tile_body(
        x_ref, gt_ref, cw_ref, j, c=c, ignore_index=ignore_index,
        num_classes=num_classes, hw=hw, tile=tile, has_pad=has_pad)

    dist_ref[0] = dist
    ce_ref[0] = ce

    @pl.when(j == 0)
    def _():
        dmin_ref[...] = jnp.full((1, 1, 1), jnp.inf, jnp.float32)
        dmax_ref[...] = jnp.full((1, 1, 1), -jnp.inf, jnp.float32)

    dmin_ref[...] = jnp.minimum(dmin_ref[...], tmin)
    dmax_ref[...] = jnp.maximum(dmax_ref[...], tmax)


# Pass 2: sublane-dense threshold + hyperbolic weights + per-image sum.
def _pass2_kernel(dist_ref, ce_ref, dmin_ref, dmax_ref, out_ref, acc_sc, *,
                  t, hr, rows, r2, n2, mask_rows, approx):
    j = pl.program_id(1)

    @pl.when(j == 0)
    def _():
        acc_sc[...] = jnp.zeros((8, 128), jnp.float32)

    d = dist_ref[0]                              # (r2, 128) sublane-dense
    cel = ce_ref[0]                              # (r2, 128)
    dmin = dmin_ref[0]                           # (1, 1)
    dmax = dmax_ref[0]                           # (1, 1)
    thresh = dmin + (dmax - dmin) * hr
    inv_dmax = 1.0 / dmax

    w = jnp.log(t + d * inv_dmax)
    w = pl.reciprocal(w, approx=True) if approx else 1.0 / w
    w = jnp.where(d <= thresh, w, 0.0)
    contrib = w * cel
    if mask_rows:
        ridx = j * r2 + lax.broadcasted_iota(jnp.int32, (r2, 128), 0)
        contrib = jnp.where(ridx < rows, contrib, 0.0)

    # Lane-vector partial accumulation; full reduce only on the last step.
    acc_sc[...] += jnp.sum(contrib.reshape(r2 // 8, 8, 128), axis=0)

    @pl.when(j == n2 - 1)
    def _():
        out_ref[...] = jnp.sum(acc_sc[...]).reshape(1, 1, 1)


# ---------------------------------------------------------------------------
# Wrapper
# ---------------------------------------------------------------------------
def hyperbolic_uncertainty_loss(predict_nchw, gt_bhw, *, num_classes=19,
                                ignore_index=255, c=0.1, t=2.718, hr=1.0,
                                class_weights=None, tile_hw=32768,
                                approx_reciprocal=True, force_two_pass=False):
    """Forward of HyperbolicUncertaintyLoss with reduction='sum'."""
    B, C, H, W = predict_nchw.shape
    assert C == num_classes, "predict channel count must equal num_classes"
    HW = H * W

    # No NCHW->NHWC transpose and no HBM-copying jnp.pad: the last HW tile may
    # overhang and is masked inside the kernel.
    x = predict_nchw.reshape(B, C, HW)
    if not jnp.issubdtype(x.dtype, jnp.floating):
        x = x.astype(jnp.float32)
    gt = gt_bhw.reshape(B, 1, HW).astype(jnp.int32)

    if class_weights is None:
        class_weights = jnp.ones((num_classes,), jnp.float32)
    cw = jnp.asarray(class_weights, jnp.float32)
    assert cw.shape == (num_classes,), "class_weights must have num_classes entries"
    cw = cw.reshape(C, 1)

    # HW tiling: tiles are multiples of 1024 (keeps hw_pad a multiple of 8*128
    # for the sublane-dense pass-2 view) and never exceed HW, so no block dim
    # is ever larger than the corresponding array dim.  Tiny images use a
    # single full-extent block.
    if HW >= 1024:
        tile = min(_round_up(int(tile_hw), 1024), (HW // 1024) * 1024)
    else:
        tile = HW
    num_tiles = _cdiv(HW, tile)
    hw_pad = num_tiles * tile
    has_pad = hw_pad != HW

    itemsize = jnp.dtype(x.dtype).itemsize
    vmem_cap = _vmem_capacity_bytes()

    blk_bytes = 2 * (C * tile * itemsize + tile * 4)   # double-buffered x + gt
    tmp_bytes = 8 * C * tile * 4                       # (C,T) temporaries headroom
    scr_bytes = 2 * hw_pad * 4                         # VMEM-resident dist + ce
    fused_need = blk_bytes + tmp_bytes + scr_bytes + (2 << 20)
    use_fused = (HW < 1024) or (
        (not force_two_pass) and fused_need <= int(0.7 * vmem_cap))

    grid = (B, num_tiles)
    x_spec = pl.BlockSpec((1, C, tile), lambda b, j: (b, 0, j))
    gt_spec = pl.BlockSpec((1, 1, tile), lambda b, j: (b, 0, j))
    cw_spec = pl.BlockSpec((C, 1), lambda b, j: (0, 0))
    row_spec = pl.BlockSpec((1, 1, tile), lambda b, j: (b, 0, j))
    scalar_spec = pl.BlockSpec((1, 1, 1), lambda b, j: (b, 0, 0))
    dims = ("parallel", "arbitrary")

    if use_fused:
        kern = functools.partial(
            _fused_kernel, c=float(c), ignore_index=int(ignore_index),
            num_classes=int(num_classes), hw=int(HW), tile=int(tile),
            has_pad=bool(has_pad), num_tiles=int(num_tiles), t=float(t),
            hr=float(hr), approx=bool(approx_reciprocal))
        vmem_limit = int(min(0.9 * vmem_cap, max(2 * fused_need, 32 << 20)))
        per_image = pl.pallas_call(
            kern,
            out_shape=jax.ShapeDtypeStruct((B, 1, 1), jnp.float32),
            grid_spec=pltpu.PrefetchScalarGridSpec(
                num_scalar_prefetch=0, grid=grid,
                in_specs=[x_spec, gt_spec, cw_spec],
                out_specs=scalar_spec,
                scratch_shapes=[
                    pltpu.VMEM((num_tiles, 1, tile), jnp.float32),  # dist
                    pltpu.VMEM((num_tiles, 1, tile), jnp.float32),  # ce
                    pltpu.VMEM((1, 1), jnp.float32),                # dmin
                    pltpu.VMEM((1, 1), jnp.float32),                # dmax
                ]),
            compiler_params=pltpu.CompilerParams(
                dimension_semantics=dims, vmem_limit_bytes=vmem_limit),
        )(x, gt, cw)
        # reduction='sum'
        return jnp.sum(per_image)

    # ---------------- two-pass fallback (HW too large for VMEM) -------------
    assert hw_pad % 1024 == 0
    k1 = functools.partial(
        _pass1_kernel, c=float(c), ignore_index=int(ignore_index),
        num_classes=int(num_classes), hw=int(HW), tile=int(tile),
        has_pad=bool(has_pad))
    p1_need = blk_bytes + tmp_bytes + 2 * (2 * tile * 4) + (2 << 20)
    p1_vmem = int(min(0.9 * vmem_cap, max(p1_need, 32 << 20)))
    dist, ce_arr, dmin, dmax = pl.pallas_call(
        k1,
        out_shape=(
            jax.ShapeDtypeStruct((B, 1, hw_pad), jnp.float32),
            jax.ShapeDtypeStruct((B, 1, hw_pad), jnp.float32),
            jax.ShapeDtypeStruct((B, 1, 1), jnp.float32),
            jax.ShapeDtypeStruct((B, 1, 1), jnp.float32),
        ),
        grid_spec=pltpu.PrefetchScalarGridSpec(
            num_scalar_prefetch=0, grid=grid,
            in_specs=[x_spec, gt_spec, cw_spec],
            out_specs=[row_spec, row_spec, scalar_spec, scalar_spec]),
        compiler_params=pltpu.CompilerParams(
            dimension_semantics=dims, vmem_limit_bytes=p1_vmem),
    )(x, gt, cw)

    # Free contiguous views -> sublane-dense layout for pass 2.
    rows = hw_pad // 128                 # multiple of 8 by construction
    dist2 = dist.reshape(B, rows, 128)
    ce2 = ce_arr.reshape(B, rows, 128)

    r2 = min(2048, rows)                 # 2048 rows * 128 lanes = 256K elems/step
    n2 = _cdiv(rows, r2)
    mask_rows = n2 * r2 != rows

    k2 = functools.partial(
        _pass2_kernel, t=float(t), hr=float(hr), rows=int(rows), r2=int(r2),
        n2=int(n2), mask_rows=bool(mask_rows), approx=bool(approx_reciprocal))
    p2_vmem = int(min(0.9 * vmem_cap,
                      max(8 * (r2 * 128 * 4) + (2 << 20), 16 << 20)))
    tile2_spec = pl.BlockSpec((1, r2, 128), lambda b, j: (b, j, 0))
    per_image = pl.pallas_call(
        k2,
        out_shape=jax.ShapeDtypeStruct((B, 1, 1), jnp.float32),
        grid_spec=pltpu.PrefetchScalarGridSpec(
            num_scalar_prefetch=0, grid=(B, n2),
            in_specs=[tile2_spec, tile2_spec, scalar_spec, scalar_spec],
            out_specs=scalar_spec,
            scratch_shapes=[pltpu.VMEM((8, 128), jnp.float32)]),
        compiler_params=pltpu.CompilerParams(
            dimension_semantics=dims, vmem_limit_bytes=p2_vmem),
    )(dist2, ce2, dmin, dmax)

    # reduction='sum'
    # TODO(synk): reduction='mean' (torch.histc-based normalization) not implemented.
    return jnp.sum(per_image)


# ---------------------------------------------------------------------------
# Pure-JAX reference mirroring the PyTorch module (reduction='sum').
# ---------------------------------------------------------------------------
def _reference_loss(predict, gt, *, num_classes=19, ignore_index=255,
                    c=0.1, t=2.718, hr=1.0, class_weights=None):
    B, C, H, W = predict.shape
    p = jax.nn.softmax(predict, axis=1)                       # B,C,H,W
    sqrt_c = float(c) ** 0.5
    nrm = jnp.sqrt(jnp.sum(p * p, axis=1))                    # B,H,W
    z = jnp.minimum(sqrt_c * nrm, 1.0 - 2.0 ** -20)
    dist = (2.0 / sqrt_c) * jnp.arctanh(z)
    flat = dist.reshape(B, -1)
    dmin = flat.min(axis=-1, keepdims=True)
    dmax = flat.max(axis=-1, keepdims=True)
    thr = (dmin + (dmax - dmin) * hr).reshape(B, 1, 1)
    dmax3 = dmax.reshape(B, 1, 1)
    mask = (dist <= thr).astype(jnp.float32)
    hyper_w = 1.0 / jnp.log(t + dist / dmax3) * mask

    logp = jax.nn.log_softmax(predict, axis=1)
    if class_weights is None:
        class_weights = jnp.ones((num_classes,), jnp.float32)
    valid = (gt != ignore_index) & (gt >= 0) & (gt < num_classes)
    gt_safe = jnp.where(valid, gt, 0)
    nll = -jnp.take_along_axis(logp, gt_safe[:, None], axis=1)[:, 0]  # B,H,W
    pix_w = class_weights[gt_safe]
    ce = nll * pix_w * valid.astype(jnp.float32)
    return jnp.sum(hyper_w * ce)


if __name__ == "__main__":
    key = jax.random.PRNGKey(0)
    k1, k2 = jax.random.split(key)

    params = dict(num_classes=19, ignore_index=255, c=0.1, t=2.718, hr=0.7)

    # HW = 1600 with tile_hw=1024 -> 2 tiles, last tile overhangs the array
    # (exercises the no-pad in-kernel masking on both code paths).
    B, C, H, W = 2, 19, 40, 40
    predict = jax.random.normal(k1, (B, C, H, W), jnp.float32)
    gt = jax.random.randint(k2, (B, H, W), 0, C).astype(jnp.int32)
    gt = gt.at[:, :2, :2].set(255)          # exercise ignore_index

    ref = jax.block_until_ready(_reference_loss(predict, gt, **params))

    out_fused = jax.block_until_ready(
        hyperbolic_uncertainty_loss(predict, gt, tile_hw=1024, **params))
    assert jnp.allclose(out_fused, ref, rtol=1e-3, atol=1e-3), (out_fused, ref)

    out_two_pass = jax.block_until_ready(
        hyperbolic_uncertainty_loss(predict, gt, tile_hw=1024,
                                    force_two_pass=True, **params))
    assert jnp.allclose(out_two_pass, ref, rtol=1e-3, atol=1e-3), (out_two_pass, ref)

    # Tiny image (HW < 1024): single full-extent block, B=1.
    k3, k4 = jax.random.split(k2)
    predict_s = jax.random.normal(k3, (1, 19, 16, 16), jnp.float32)
    gt_s = jax.random.randint(k4, (1, 16, 16), 0, 19).astype(jnp.int32)
    ref_s = jax.block_until_ready(_reference_loss(predict_s, gt_s, **params))
    out_s = jax.block_until_ready(
        hyperbolic_uncertainty_loss(predict_s, gt_s, **params))
    assert jnp.allclose(out_s, ref_s, rtol=1e-3, atol=1e-3), (out_s, ref_s)

    print("KERNEL_OK")
</pallas_src>

<mosaic_0001>
module attributes {stable_mosaic.version = 11 : i64} {
  func.func @_fused_kernel(%arg0: i32, %arg1: i32, %arg2: memref<1x19x1024xf32, #tpu.memory_space<vmem>>, %arg3: memref<1x1x1024xi32, #tpu.memory_space<vmem>>, %arg4: memref<19x1xf32, #tpu.memory_space<vmem>>, %arg5: memref<1x1x1xf32, #tpu.memory_space<vmem>>, %arg6: memref<2x1x1024xf32, #tpu.memory_space<vmem>>, %arg7: memref<2x1x1024xf32, #tpu.memory_space<vmem>>, %arg8: memref<1x1xf32, #tpu.memory_space<vmem>>, %arg9: memref<1x1xf32, #tpu.memory_space<vmem>>) attributes {dimension_semantics = [#tpu.dimension_semantics<parallel>, #tpu.dimension_semantics<arbitrary>], iteration_bounds = array<i64: 2, 2>, scalar_prefetch = 0 : i64, scratch_operands = 4 : i64, tpu.core_type = #tpu.core_type<tc>, window_params = [{transform_indices = @transform_0, window_bounds = array<i64: 1, 19, 1024>}, {transform_indices = @transform_1, window_bounds = array<i64: 1, 1, 1024>}, {pipeline_mode = #tpu.pipeline_mode<synchronous>, transform_indices = @transform_2, window_bounds = array<i64: 19, 1>}, {transform_indices = @transform_3, window_bounds = array<i64: 1, 1, 1>}]} {
    %c0 = arith.constant 0 : index
    %c0_0 = arith.constant 0 : index
    %c0_1 = arith.constant 0 : index
    %0 = vector.load %arg2[%c0, %c0_0, %c0_1] : memref<1x19x1024xf32, #tpu.memory_space<vmem>>, vector<1x19x1024xf32>
    %1 = vector.shape_cast %0 : vector<1x19x1024xf32> to vector<19x1024xf32>
    %c0_2 = arith.constant 0 : index
    %c0_3 = arith.constant 0 : index
    %c0_4 = arith.constant 0 : index
    %2 = vector.load %arg3[%c0_2, %c0_3, %c0_4] : memref<1x1x1024xi32, #tpu.memory_space<vmem>>, vector<1x1x1024xi32>
    %3 = vector.shape_cast %2 : vector<1x1x1024xi32> to vector<1x1024xi32>
    %c0_5 = arith.constant 0 : index
    %c0_6 = arith.constant 0 : index
    %4 = vector.load %arg4[%c0_5, %c0_6] : memref<19x1xf32, #tpu.memory_space<vmem>>, vector<19x1xf32>
    %cst = arith.constant dense<0xFF800000> : vector<1024xf32>
    %5 = vector.multi_reduction <maximumf>, %1, %cst [0] : vector<19x1024xf32> to vector<1024xf32>
    %6 = vector.shape_cast %5 : vector<1024xf32> to vector<1x1024xf32>
    %7 = vector.broadcast %6 : vector<1x1024xf32> to vector<19x1024xf32>
    %8 = arith.subf %1, %7 : vector<19x1024xf32>
    %9 = math.exp %8 : vector<19x1024xf32>
    %cst_7 = arith.constant dense<0.000000e+00> : vector<1024xf32>
    %10 = vector.multi_reduction <add>, %9, %cst_7 [0] : vector<19x1024xf32> to vector<1024xf32>
    %11 = vector.shape_cast %10 : vector<1024xf32> to vector<1x1024xf32>
    %12 = math.log %11 : vector<1x1024xf32>
    %13 = arith.mulf %9, %9 : vector<19x1024xf32>
    %cst_8 = arith.constant dense<0.000000e+00> : vector<1024xf32>
    %14 = vector.multi_reduction <add>, %13, %cst_8 [0] : vector<19x1024xf32> to vector<1024xf32>
    %15 = vector.shape_cast %14 : vector<1024xf32> to vector<1x1024xf32>
    %16 = math.sqrt %15 : vector<1x1024xf32>
    %17 = arith.divf %16, %11 : vector<1x1024xf32>
    %cst_9 = arith.constant 0.316227764 : f32
    %18 = vector.broadcast %cst_9 : f32 to vector<1x1024xf32>
    %19 = arith.mulf %18, %17 : vector<1x1024xf32>
    %cst_10 = arith.constant 0.999999046 : f32
    %20 = vector.broadcast %cst_10 : f32 to vector<1x1024xf32>
    %21 = arith.minimumf %19, %20 : vector<1x1024xf32>
    %cst_11 = arith.constant 1.000000e+00 : f32
    %22 = vector.broadcast %cst_11 : f32 to vector<1x1024xf32>
    %23 = arith.addf %22, %21 : vector<1x1024xf32>
    %cst_12 = arith.constant 1.000000e+00 : f32
    %24 = vector.broadcast %cst_12 : f32 to vector<1x1024xf32>
    %25 = arith.subf %24, %21 : vector<1x1024xf32>
    %26 = arith.divf %23, %25 : vector<1x1024xf32>
    %27 = math.log %26 : vector<1x1024xf32>
    %cst_13 = arith.constant 3.1622777 : f32
    %28 = vector.broadcast %cst_13 : f32 to vector<1x1024xf32>
    %29 = arith.mulf %28, %27 : vector<1x1024xf32>
    %30 = tpu.iota {dimensions = array<i32: 0>} : vector<19x1024xi32>
    %31 = vector.broadcast %3 : vector<1x1024xi32> to vector<19x1024xi32>
    %32 = arith.cmpi eq, %31, %30 : vector<19x1024xi32>
    %cst_14 = arith.constant 0.000000e+00 : f32
    %33 = vector.broadcast %cst_14 : f32 to vector<19x1024xf32>
    %34 = arith.select %32, %8, %33 : vector<19x1024xi1>, vector<19x1024xf32>
    %cst_15 = arith.constant dense<0.000000e+00> : vector<1024xf32>
    %35 = vector.multi_reduction <add>, %34, %cst_15 [0] : vector<19x1024xf32> to vector<1024xf32>
    %36 = vector.shape_cast %35 : vector<1024xf32> to vector<1x1024xf32>
    %cst_16 = arith.constant 0.000000e+00 : f32
    %37 = vector.shape_cast %4 : vector<19x1xf32> to vector<19x1xf32>
    %38 = vector.broadcast %37 : vector<19x1xf32> to vector<19x1024xf32>
    %39 = vector.broadcast %cst_16 : f32 to vector<19x1024xf32>
    %40 = arith.select %32, %38, %39 : vector<19x1024xi1>, vector<19x1024xf32>
    %cst_17 = arith.constant dense<0.000000e+00> : vector<1024xf32>
    %41 = vector.multi_reduction <add>, %40, %cst_17 [0] : vector<19x1024xf32> to vector<1024xf32>
    %42 = vector.shape_cast %41 : vector<1024xf32> to vector<1x1024xf32>
    %cst_18 = arith.constant 0.000000e+00 : f32
    %43 = vector.broadcast %cst_18 : f32 to vector<1x1024xf32>
    %44 = arith.subf %43, %42 : vector<1x1024xf32>
    %45 = arith.subf %36, %12 : vector<1x1024xf32>
    %46 = arith.mulf %44, %45 : vector<1x1024xf32>
    %c1024_i32 = arith.constant 1024 : i32
    %47 = arith.muli %arg1, %c1024_i32 : i32
    %48 = tpu.iota {dimensions = array<i32: 1>} : vector<1x1024xi32>
    %49 = vector.broadcast %47 : i32 to vector<1x1024xi32>
    %50 = arith.addi %49, %48 : vector<1x1024xi32>
    %c1600_i32 = arith.constant 1600 : i32
    %51 = vector.broadcast %c1600_i32 : i32 to vector<1x1024xi32>
    %52 = arith.cmpi slt, %50, %51 : vector<1x1024xi32>
    %cst_19 = arith.constant 0x7F800000 : f32
    %53 = vector.broadcast %cst_19 : f32 to vector<1x1024xf32>
    %54 = arith.select %52, %29, %53 : vector<1x1024xi1>, vector<1x1024xf32>
    %cst_20 = arith.constant dense<0x7F800000> : vector<1xf32>
    %55 = vector.multi_reduction <minimumf>, %54, %cst_20 [1] : vector<1x1024xf32> to vector<1xf32>
    %56 = vector.shape_cast %55 : vector<1xf32> to vector<1x1xf32>
    %cst_21 = arith.constant 0xFF800000 : f32
    %57 = vector.broadcast %cst_21 : f32 to vector<1x1024xf32>
    %58 = arith.select %52, %29, %57 : vector<1x1024xi1>, vector<1x1024xf32>
    %cst_22 = arith.constant dense<0xFF800000> : vector<1xf32>
    %59 = vector.multi_reduction <maximumf>, %58, %cst_22 [1] : vector<1x1024xf32> to vector<1xf32>
    %60 = vector.shape_cast %59 : vector<1xf32> to vector<1x1xf32>
    %cst_23 = arith.constant 0.000000e+00 : f32
    %61 = vector.broadcast %cst_23 : f32 to vector<1x1024xf32>
    %62 = arith.select %52, %29, %61 : vector<1x1024xi1>, vector<1x1024xf32>
    %cst_24 = arith.constant 0.000000e+00 : f32
    %63 = vector.broadcast %cst_24 : f32 to vector<1x1024xf32>
    %64 = arith.select %52, %46, %63 : vector<1x1024xi1>, vector<1x1024xf32>
    %65 = arith.index_cast %arg1 : i32 to index
    %c0_25 = arith.constant 0 : index
    %c0_26 = arith.constant 0 : index
    %66 = vector.load %arg6[%65, %c0_25, %c0_26] : memref<2x1x1024xf32, #tpu.memory_space<vmem>>, vector<1x1x1024xf32>
    %67 = vector.shape_cast %66 : vector<1x1x1024xf32> to vector<1x1024xf32>
    %68 = vector.shape_cast %62 : vector<1x1024xf32> to vector<1x1x1024xf32>
    tpu.vector_store %arg6[%65, %c0_25, %c0_26], %68 {strides = array<i32>} : memref<2x1x1024xf32, #tpu.memory_space<vmem>>, vector<1x1x1024xf32>,
    %69 = arith.index_cast %arg1 : i32 to index
    %c0_27 = arith.constant 0 : index
    %c0_28 = arith.constant 0 : index
    %70 = vector.load %arg7[%69, %c0_27, %c0_28] : memref<2x1x1024xf32, #tpu.memory_space<vmem>>, vector<1x1x1024xf32>
    %71 = vector.shape_cast %70 : vector<1x1x1024xf32> to vector<1x1024xf32>
    %72 = vector.shape_cast %64 : vector<1x1024xf32> to vector<1x1x1024xf32>
    tpu.vector_store %arg7[%69, %c0_27, %c0_28], %72 {strides = array<i32>} : memref<2x1x1024xf32, #tpu.memory_space<vmem>>, vector<1x1x1024xf32>,
    %c0_i32 = arith.constant 0 : i32
    %73 = arith.cmpi eq, %arg1, %c0_i32 : i32
    %74 = arith.extui %73 : i1 to i32
    %c0_i32_29 = arith.constant 0 : i32
    %75 = arith.cmpi ne, %74, %c0_i32_29 : i32
    scf.if %75 {
      %cst_39 = arith.constant 0.000000e+00 : f32
      %85 = vector.broadcast %cst_39 : f32 to vector<1x1x1xf32>
      %c0_40 = arith.constant 0 : index
      %c0_41 = arith.constant 0 : index
      %c0_42 = arith.constant 0 : index
      %86 = vector.load %arg5[%c0_40, %c0_41, %c0_42] : memref<1x1x1xf32, #tpu.memory_space<vmem>>, vector<1x1x1xf32>
      tpu.vector_store %arg5[%c0_40, %c0_41, %c0_42], %85 {strides = array<i32>} : memref<1x1x1xf32, #tpu.memory_space<vmem>>, vector<1x1x1xf32>,
      %cst_43 = arith.constant 0x7F800000 : f32
      %87 = vector.broadcast %cst_43 : f32 to vector<1x1xf32>
      %c0_44 = arith.constant 0 : index
      %c0_45 = arith.constant 0 : index
      %88 = vector.load %arg8[%c0_44, %c0_45] : memref<1x1xf32, #tpu.memory_space<vmem>>, vector<1x1xf32>
      tpu.vector_store %arg8[%c0_44, %c0_45], %87 {strides = array<i32>} : memref<1x1xf32, #tpu.memory_space<vmem>>, vector<1x1xf32>,
      %cst_46 = arith.constant 0xFF800000 : f32
      %89 = vector.broadcast %cst_46 : f32 to vector<1x1xf32>
      %c0_47 = arith.constant 0 : index
      %c0_48 = arith.constant 0 : index
      %90 = vector.load %arg9[%c0_47, %c0_48] : memref<1x1xf32, #tpu.memory_space<vmem>>, vector<1x1xf32>
      tpu.vector_store %arg9[%c0_47, %c0_48], %89 {strides = array<i32>} : memref<1x1xf32, #tpu.memory_space<vmem>>, vector<1x1xf32>,
    } else {
    }
    %c0_30 = arith.constant 0 : index
    %c0_31 = arith.constant 0 : index
    %76 = vector.load %arg8[%c0_30, %c0_31] : memref<1x1xf32, #tpu.memory_space<vmem>>, vector<1x1xf32>
    %77 = arith.minimumf %76, %56 : vector<1x1xf32>
    %c0_32 = arith.constant 0 : index
    %c0_33 = arith.constant 0 : index
    %78 = vector.load %arg8[%c0_32, %c0_33] : memref<1x1xf32, #tpu.memory_space<vmem>>, vector<1x1xf32>
    tpu.vector_store %arg8[%c0_32, %c0_33], %77 {strides = array<i32>} : memref<1x1xf32, #tpu.memory_space<vmem>>, vector<1x1xf32>,
    %c0_34 = arith.constant 0 : index
    %c0_35 = arith.constant 0 : index
    %79 = vector.load %arg9[%c0_34, %c0_35] : memref<1x1xf32, #tpu.memory_space<vmem>>, vector<1x1xf32>
    %80 = arith.maximumf %79, %60 : vector<1x1xf32>
    %c0_36 = arith.constant 0 : index
    %c0_37 = arith.constant 0 : index
    %81 = vector.load %arg9[%c0_36, %c0_37] : memref<1x1xf32, #tpu.memory_space<vmem>>, vector<1x1xf32>
    tpu.vector_store %arg9[%c0_36, %c0_37], %80 {strides = array<i32>} : memref<1x1xf32, #tpu.memory_space<vmem>>, vector<1x1xf32>,
    %c1_i32 = arith.constant 1 : i32
    %82 = arith.cmpi eq, %arg1, %c1_i32 : i32
    %83 = arith.extui %82 : i1 to i32
    %c0_i32_38 = arith.constant 0 : i32
    %84 = arith.cmpi ne, %83, %c0_i32_38 : i32
    scf.if %84 {
      %c0_39 = arith.constant 0 : index
      %c0_40 = arith.constant 0 : index
      %85 = vector.load %arg8[%c0_39, %c0_40] : memref<1x1xf32, #tpu.memory_space<vmem>>, vector<1x1xf32>
      %c0_41 = arith.constant 0 : index
      %c0_42 = arith.constant 0 : index
      %86 = vector.load %arg9[%c0_41, %c0_42] : memref<1x1xf32, #tpu.memory_space<vmem>>, vector<1x1xf32>
      %87 = arith.subf %86, %85 : vector<1x1xf32>
      %cst_43 = arith.constant 0.699999988 : f32
      %88 = vector.broadcast %cst_43 : f32 to vector<1x1xf32>
      %89 = arith.mulf %87, %88 : vector<1x1xf32>
      %90 = arith.addf %85, %89 : vector<1x1xf32>
      %cst_44 = arith.constant 1.000000e+00 : f32
      %91 = vector.broadcast %cst_44 : f32 to vector<1x1xf32>
      %92 = arith.divf %91, %86 : vector<1x1xf32>
      %cst_45 = arith.constant 0.000000e+00 : f32
      %93 = vector.broadcast %cst_45 : f32 to vector<1x1024xf32>
      %c0_i32_46 = arith.constant 0 : i32
      %c2_i32 = arith.constant 2 : i32
      %94 = arith.addi %c0_i32_46, %c2_i32 : i32
      %c1_i32_47 = arith.constant 1 : i32
      %95 = scf.for %arg10 = %c0_i32_46 to %94 step %c1_i32_47 iter_args(%arg11 = %93) -> (vector<1x1024xf32>)  : i32 {
        %102 = arith.index_cast %arg10 : i32 to index
        %c0_53 = arith.constant 0 : index
        %c0_54 = arith.constant 0 : index
        %103 = vector.load %arg6[%102, %c0_53, %c0_54] : memref<2x1x1024xf32, #tpu.memory_space<vmem>>, vector<1x1x1024xf32>
        %104 = vector.shape_cast %103 : vector<1x1x1024xf32> to vector<1x1024xf32>
        %105 = vector.broadcast %92 : vector<1x1xf32> to vector<1x1024xf32>
        %106 = arith.mulf %104, %105 : vector<1x1024xf32>
        %cst_55 = arith.constant 2.718000e+00 : f32
        %107 = vector.broadcast %cst_55 : f32 to vector<1x1024xf32>
        %108 = arith.addf %107, %106 : vector<1x1024xf32>
        %109 = math.log %108 : vector<1x1024xf32>
        %110 = tpu.reciprocal %109 {approx = true} : vector<1x1024xf32> -> vector<1x1024xf32>
        %111 = vector.broadcast %90 : vector<1x1xf32> to vector<1x1024xf32>
        %112 = arith.cmpf ole, %104, %111 : vector<1x1024xf32>
        %cst_56 = arith.constant 0.000000e+00 : f32
        %113 = vector.broadcast %cst_56 : f32 to vector<1x1024xf32>
        %114 = arith.select %112, %110, %113 : vector<1x1024xi1>, vector<1x1024xf32>
        %115 = arith.index_cast %arg10 : i32 to index
        %c0_57 = arith.constant 0 : index
        %c0_58 = arith.constant 0 : index
        %116 = vector.load %arg7[%115, %c0_57, %c0_58] : memref<2x1x1024xf32, #tpu.memory_space<vmem>>, vector<1x1x1024xf32>
        %117 = vector.shape_cast %116 : vector<1x1x1024xf32> to vector<1x1024xf32>
        %118 = arith.mulf %114, %117 : vector<1x1024xf32>
        %119 = arith.addf %arg11, %118 : vector<1x1024xf32>
        scf.yield %119 : vector<1x1024xf32>
      }
      %c2_i32_48 = arith.constant 2 : i32
      %96 = vector.shape_cast %95 : vector<1x1024xf32> to vector<1x1x1024xf32>
      %cst_49 = arith.constant dense<0.000000e+00> : vector<1xf32>
      %97 = vector.multi_reduction <add>, %96, %cst_49 [1, 2] : vector<1x1x1024xf32> to vector<1xf32>
      %98 = vector.shape_cast %97 : vector<1xf32> to vector<1x1x1xf32>
      %99 = vector.extract %98[0, 0, 0] : f32 from vector<1x1x1xf32>
      %100 = vector.broadcast %99 : f32 to vector<1x1x1xf32>
      %c0_50 = arith.constant 0 : index
      %c0_51 = arith.constant 0 : index
      %c0_52 = arith.constant 0 : index
      %101 = vector.load %arg5[%c0_50, %c0_51, %c0_52] : memref<1x1x1xf32, #tpu.memory_space<vmem>>, vector<1x1x1xf32>
      tpu.vector_store %arg5[%c0_50, %c0_51, %c0_52], %100 {strides = array<i32>} : memref<1x1x1xf32, #tpu.memory_space<vmem>>, vector<1x1x1xf32>,
    } else {
    }
    return
  }
  func.func @transform_0(%arg0: i32, %arg1: i32) -> (i32, i32, i32) {
    %c0_i32 = arith.constant 0 : i32
    %c0_i32_0 = arith.constant 0 : i32
    return %arg0, %c0_i32, %arg1 : i32, i32, i32
  }
  func.func @transform_1(%arg0: i32, %arg1: i32) -> (i32, i32, i32) {
    %c0_i32 = arith.constant 0 : i32
    %c0_i32_0 = arith.constant 0 : i32
    return %arg0, %c0_i32, %arg1 : i32, i32, i32
  }
  func.func @transform_2(%arg0: i32, %arg1: i32) -> (i32, i32) {
    %c0_i32 = arith.constant 0 : i32
    %c0_i32_0 = arith.constant 0 : i32
    %c0_i32_1 = arith.constant 0 : i32
    return %c0_i32, %c0_i32_0 : i32, i32
  }
  func.func @transform_3(%arg0: i32, %arg1: i32) -> (i32, i32, i32) {
    %c0_i32 = arith.constant 0 : i32
    %c0_i32_0 = arith.constant 0 : i32
    %c0_i32_1 = arith.constant 0 : i32
    return %arg0, %c0_i32, %c0_i32_0 : i32, i32, i32
  }
}

</mosaic_0001>

<bundles_post_ra>
// kernel: tpu_custom_call.1
= control target key start
LH: loop header
LB: loop body
LE: loop exit
PB: predicated region body
PF: predicated region fallthrough
CT: control target
= control target key end

     0   :  { %s4038_s0 = inlined_call_operand.vmem [shape: f32[2,19,1600], index: 0, kind: input, shape index: {}]   ;;  %s4039_s1 = inlined_call_operand.vmem [shape: s32[2,1,1600], index: 1, kind: input, shape index: {}]   ;;  %s4040_s2 = inlined_call_operand.vmem [shape: f32[19,1], index: 2, kind: input, shape index: {}]   ;;  %s4041_s3 = inlined_call_operand.vmem [shape: f32[2,1,1], index: 3, kind: output, shape index: {}]  }
   0x1   :  { %4104 = sst [smem:[#allocation32_spill]] %s4038_s0 }
   0x2   :  { %s2628_s12 = smov 0   ;;  %s2630_s13 = smov 0  }
   0x3   :  { %s2632_s14 = smov 0   ;;  %s2634_s15 = smov 0  }
   0x4   :  { %s2636_s16 = smov 0   ;;  %s2638_s17 = smov 0  }
   0x5   :  { %s2640_s18 = smov 0  }
   0x6 LB: > { %s22_s19 = sadd.s32 1, %s2518_s16  ;;  %s25_s20 = sadd.s32 1, %s2522_s17  ;;  %s2526_s18 = sphi %s2640_s18, %s13_s18   ;;  %s2522_s17 = sphi %s2638_s17, %s4248_s17   ;;  %s2518_s16 = sphi %s2636_s16, %s4247_s16   ;;  %s2514_s15 = sphi %s2634_s15, %s4246_s15   ;;  %s2510_s14 = sphi %s2632_s14, %s4245_s14   ;;  %s2506_s13 = sphi %s2630_s13, %s4244_s13   ;;  %s2502_s12 = sphi %s2628_s12, %s4243_s12  }
   0x7   : > { %p23_p0 = scmp.ge.s32.totalorder %s22_s19, 2  ;;  %p41_p1 = scmp.ne.s32.totalorder %s2506_s13, %s2502_s12 }
   0x8   : > { %p42_p2 = scmp.eq.s32.totalorder %s2526_s18, 0  ;;  %s34_s24 = sadd.s32 1, %s2506_s13 }
   0x9   : > { %s4250_s19 = smov (%p23_p0, %s22_s19), 0  ;;  %s4252_s20 = smov (!%p23_p0, %s25_s20), %s2522_s17 }
   0xa   : > { %p43_p3 = por %p42_p2, %p41_p1  ;;  %p27_p4 = scmp.ge.s32.totalorder %s4252_s20, 2 }
   0xb   : > { %s30_s21 = ssub.s32 %s2518_s16, %s4250_s19  ;;  %p2008_p6 = scmp.ge.s32.totalorder %s2526_s18, 4 }
   0xc   : > { %s4254_s20 = smov (%p27_p4, %s4252_s20), 0 }
   0xd   : > { %4105 = sst [smem:[#allocation7_spill]] %s4254_s20  ;;  %s29_s22 = ssub.s32 %s2522_s17, %s4254_s20 }
   0xe   : > { %s31_s23 = sor.u32 %s30_s21, %s29_s22  ;;  %145 = sbr.rel (%p2008_p6) target bundleno = 188 (0xbc), region = 20 }
   0xf   : > { %p32_p5 = scmp.eq.s32.totalorder %s31_s23, 0 }
  0x11   : > { %s2679_s25 = scalar_select %p32_p5, %s2506_s13, %s34_s24  }
  0x13   : > { %148 = sbr.rel (!%p43_p3) target bundleno = 188 (0xbc), region = 24  ;;  %s150_s26 = sand.u32 (%p43_p3), 1, %s2506_s13  }
  0x14   : > { %s2009_s27 = sshll.u32 (%p43_p3), %s2518_s16, 3  ;;  %s2039_s28 = smul.u32 (%p43_p3), 192, %s150_s26 }
  0x15   : > { %s154_s29 = ssub.s32 (%p43_p3), 13, %s2009_s27  ;;  %s2040_s30 = smul.u32 (%p43_p3), 39, %s2522_s17 }
  0x16   : > { %p155_p7 = scmp.lt.s32.totalorder (%p43_p3), %s154_s29, 8  ;;  %s4106_s0 = sld [smem:[#allocation32_spill]] (%p43_p3) }
  0x17   : > { %s160_s4 = sadd.s32 (%p43_p3), %s2040_s30, %s2009_s27  ;;  %s2692_s11 = scalar_lea.vmem (%p43_p3), [#allocation6], %s2039_s28  }
  0x18   : > { %s4256_s29 = smov (!%p155_p7, %s154_s29), 8  ;;  %s2011_s6 = sshll.u32 %s160_s4, 3 }
  0x19   : > { %s157_s5 = smul.u32 384, %s4256_s29  ;;  %s2690_s10 = sshll.u32 %s4256_s29, 3 }
  0x1b   : > { %p2013_p8 = scmp.eq.s32.totalorder %s157_s5, 0 }
  0x1c   : > { %s2688_s9 = scalar_lea.vmem %s4106_s0, %s2011_s6   ;;  %p167_p9 = scmp.lt.u32.totalorder (!%p2013_p8), %s2690_s10, 8 }
  0x1d   : > { %166 = sbr.rel (%p2013_p8) target bundleno = 188 (0xbc), region = 28 }
  0x22   : > { %170 = sbr.rel (%p167_p9) target bundleno = 177 (0xb1), region = 32  ;;  %s2696_s21 = sand.u32 (!%p167_p9), 7, %s2690_s10  }
  0x23   : > { %p191_p10 = scmp.eq.s32.totalorder (!%p167_p9), %s2696_s21, 0  ;;  %p2014_p11 = scmp.ne.s32.totalorder (!%p167_p9), %s2696_s21, 0 }
  0x27   : > { %194 = sbr.rel (%p2014_p11) target bundleno = 104 (0x68), region = 47  ;;  %s195_s22 = sshrl.u32 (!%p2014_p11), %s2690_s10, 3 }
  0x28   : > { %2255 = sdivrem.u32 (!%p2014_p11), %s195_s22, 24 }
  0x31   : > { %s2703_s23 = spop.drf %2255 }
  0x32   : > { %p2015_p12 = scmp.le.s32.totalorder %s2703_s23, 0 }
  0x33   : > { %s4107_s24 = smov (!%p2015_p12), %s2692_s11  ;;  %s4108_s26 = smov (!%p2015_p12), %s2688_s9 }
  0x34   : > { %1909 = sbr.rel (%p2015_p12) target bundleno = 79 (0x4f), region = 167  ;;  %s2712_s27 = smov (!%p2015_p12), 0  }
  0x35   : > { %s2714_s28 = smov (!%p2015_p12), 0  }
  0x39 LB: >> { %v235_v0 = vld [vmem:[%s2534_s26 + $0x68] sm:$0xff]  ;;  %v237_v1 = vld [vmem:[%s2534_s26 + $0x70] sm:$0xff]  ;;  %v239_v2 = vld [vmem:[%s2534_s26 + $0x78] sm:$0xff]  ;;  %s353_s29 = sadd.s32 1, %s2538_s27  ;;  %s203_s28 = sadd.s32 1, %s2542_s28   ;;  %s2542_s28 = sphi %s2714_s28, %s203_s28   ;;  %s2538_s27 = sphi %s2712_s27, %s4111_s27   ;;  %s2534_s26 = sphi %s4108_s26, %s4110_s26   ;;  %s2530_s24 = sphi %s4107_s24, %s4109_s24  }
  0x3a   : >> { %v283_v3 = vld [vmem:[%s2534_s26 + $0xd0] sm:$0xff]  ;;  %v285_v4 = vld [vmem:[%s2534_s26 + $0xd8] sm:$0xff]  ;;  %v287_v5 = vld [vmem:[%s2534_s26 + $0xe0] sm:$0xff]  ;;  %258 = vst [vmem:[%s2530_s24 + $0x40] sm:$0xff] %v235_v0  ;;  %p354_p13 = scmp.ge.s32.totalorder %s353_s29, %s2703_s23  ;;  %p202_p0 = scmp.ge.s32.totalorder %s203_s28, %s2703_s23 }
  0x3b   : >> { %260 = vst [vmem:[%s2530_s24 + $0x48] sm:$0xff] %v237_v1  ;;  %262 = vst [vmem:[%s2530_s24 + $0x50] sm:$0xff] %v239_v2  ;;  %v289_v6 = vld [vmem:[%s2534_s26 + $0xe8] sm:$0xff]  ;;  %v291_v7 = vld [vmem:[%s2534_s26 + $0xf0] sm:$0xff] }
  0x3c   : >> { %v293_v8 = vld [vmem:[%s2534_s26 + $0xf8] sm:$0xff]  ;;  %306 = vst [vmem:[%s2530_s24 + $0x80] sm:$0xff] %v283_v3  ;;  %308 = vst [vmem:[%s2530_s24 + $0x88] sm:$0xff] %v285_v4  ;;  %v295_v9 = vld [vmem:[%s2534_s26 + $0x100] sm:$0xff]  ;;  %s4258_s29 = smov (%p354_p13, %s353_s29), 0 }
  0x3d   : >> { %310 = vst [vmem:[%s2530_s24 + $0x90] sm:$0xff] %v287_v5  ;;  %v297_v10 = vld [vmem:[%s2534_s26 + $0x108] sm:$0xff]  ;;  %v299_v11 = vld [vmem:[%s2534_s26 + $0x110] sm:$0xff]  ;;  %312 = vst [vmem:[%s2530_s24 + $0x98] sm:$0xff] %v289_v6  ;;  %s356_s30 = smul.u32 192, %s4258_s29  ;;  %s4111_s27 = smov %s4258_s29 }
  0x3e   : >> { %314 = vst [vmem:[%s2530_s24 + $0xa0] sm:$0xff] %v291_v7  ;;  %316 = vst [vmem:[%s2530_s24 + $0xa8] sm:$0xff] %v293_v8  ;;  %v301_v12 = vld [vmem:[%s2534_s26 + $0x118] sm:$0xff]  ;;  %v303_v13 = vld [vmem:[%s2534_s26 + $0x120] sm:$0xff] }
  0x3f   : >> { %v209_v14 = vld [vmem:[%s2534_s26] sm:$0xff]  ;;  %318 = vst [vmem:[%s2530_s24 + $0xb0] sm:$0xff] %v295_v9  ;;  %320 = vst [vmem:[%s2530_s24 + $0xb8] sm:$0xff] %v297_v10  ;;  %v211_v15 = vld [vmem:[%s2534_s26 + $0x8] sm:$0xff]  ;;  %s358_s4 = scalar_lea.vmem %s2688_s9, %s356_s30   ;;  %s359_s5 = scalar_lea.vmem %s2692_s11, %s356_s30 [#allocation6]  }
  0x40   : >> { %322 = vst [vmem:[%s2530_s24 + $0xc0] sm:$0xff] %v299_v11  ;;  %210 = vst [vmem:[%s2530_s24] sm:$0xff] %v209_v14  ;;  %v213_v16 = vld [vmem:[%s2534_s26 + $0x10] sm:$0xff]  ;;  %v215_v17 = vld [vmem:[%s2534_s26 + $0x18] sm:$0xff] }
  0x41   : >> { %324 = vst [vmem:[%s2530_s24 + $0xc8] sm:$0xff] %v301_v12  ;;  %326 = vst [vmem:[%s2530_s24 + $0xd0] sm:$0xff] %v303_v13  ;;  %v217_v18 = vld [vmem:[%s2534_s26 + $0x20] sm:$0xff]  ;;  %v219_v19 = vld [vmem:[%s2534_s26 + $0x28] sm:$0xff] }
  0x42   : >> { %212 = vst [vmem:[%s2530_s24 + $0x8] sm:$0xff] %v211_v15  ;;  %214 = vst [vmem:[%s2530_s24 + $0x10] sm:$0xff] %v213_v16  ;;  %v221_v20 = vld [vmem:[%s2534_s26 + $0x30] sm:$0xff]  ;;  %v223_v21 = vld [vmem:[%s2534_s26 + $0x38] sm:$0xff] }
  0x43   : >> { %216 = vst [vmem:[%s2530_s24 + $0x18] sm:$0xff] %v215_v17  ;;  %218 = vst [vmem:[%s2530_s24 + $0x20] sm:$0xff] %v217_v18  ;;  %v263_v22 = vld [vmem:[%s2534_s26 + $0x80] sm:$0xff]  ;;  %v265_v23 = vld [vmem:[%s2534_s26 + $0x88] sm:$0xff] }
  0x44   : >> { %220 = vst [vmem:[%s2530_s24 + $0x28] sm:$0xff] %v219_v19  ;;  %222 = vst [vmem:[%s2530_s24 + $0x30] sm:$0xff] %v221_v20  ;;  %v267_v24 = vld [vmem:[%s2534_s26 + $0x90] sm:$0xff]  ;;  %v269_v25 = vld [vmem:[%s2534_s26 + $0x98] sm:$0xff] }
  0x45   : >> { %224 = vst [vmem:[%s2530_s24 + $0x38] sm:$0xff] %v223_v21  ;;  %264 = vst [vmem:[%s2530_s24 + $0x58] sm:$0xff] %v263_v22  ;;  %v271_v26 = vld [vmem:[%s2534_s26 + $0xa0] sm:$0xff]  ;;  %v327_v27 = vld [vmem:[%s2534_s26 + $0x128] sm:$0xff] }
  0x46   : >> { %266 = vst [vmem:[%s2530_s24 + $0x60] sm:$0xff] %v265_v23  ;;  %268 = vst [vmem:[%s2530_s24 + $0x68] sm:$0xff] %v267_v24  ;;  %v329_v28 = vld [vmem:[%s2534_s26 + $0x130] sm:$0xff]  ;;  %v331_v29 = vld [vmem:[%s2534_s26 + $0x138] sm:$0xff] }
  0x47   : >> { %270 = vst [vmem:[%s2530_s24 + $0x70] sm:$0xff] %v269_v25  ;;  %272 = vst [vmem:[%s2530_s24 + $0x78] sm:$0xff] %v271_v26  ;;  %v333_v30 = vld [vmem:[%s2534_s26 + $0x140] sm:$0xff]  ;;  %v335_v31 = vld [vmem:[%s2534_s26 + $0x148] sm:$0xff] }
  0x48   : >> { %328 = vst [vmem:[%s2530_s24 + $0xd8] sm:$0xff] %v327_v27  ;;  %330 = vst [vmem:[%s2530_s24 + $0xe0] sm:$0xff] %v329_v28  ;;  %v337_v32 = vld [vmem:[%s2534_s26 + $0x150] sm:$0xff]  ;;  %v339_v33 = vld [vmem:[%s2534_s26 + $0x158] sm:$0xff] }
  0x49   : >> { %332 = vst [vmem:[%s2530_s24 + $0xe8] sm:$0xff] %v331_v29  ;;  %334 = vst [vmem:[%s2530_s24 + $0xf0] sm:$0xff] %v333_v30  ;;  %v341_v34 = vld [vmem:[%s2534_s26 + $0x160] sm:$0xff]  ;;  %v343_v35 = vld [vmem:[%s2534_s26 + $0x168] sm:$0xff] }
  0x4a   : >> { %336 = vst [vmem:[%s2530_s24 + $0xf8] sm:$0xff] %v335_v31  ;;  %338 = vst [vmem:[%s2530_s24 + $0x100] sm:$0xff] %v337_v32  ;;  %v345_v36 = vld [vmem:[%s2534_s26 + $0x170] sm:$0xff]  ;;  %v347_v37 = vld [vmem:[%s2534_s26 + $0x178] sm:$0xff]  ;;  %205 = sbr.rel (!%p202_p0) target bundleno = 57 (0x39), region = 173 }
  0x4b   : >> { %340 = vst [vmem:[%s2530_s24 + $0x108] sm:$0xff] %v339_v33  ;;  %342 = vst [vmem:[%s2530_s24 + $0x110] sm:$0xff] %v341_v34  ;;  %v349_v38 = vld [vmem:[%s2534_s26 + $0x180] sm:$0xff]  ;;  %v351_v39 = vld [vmem:[%s2534_s26 + $0x188] sm:$0xff]  ;;  %s4110_s26 = smov %s358_s4 }
  0x4c   : >> { %344 = vst [vmem:[%s2530_s24 + $0x118] sm:$0xff] %v343_v35  ;;  %346 = vst [vmem:[%s2530_s24 + $0x120] sm:$0xff] %v345_v36 }
  0x4d   : >> { %348 = vst [vmem:[%s2530_s24 + $0x128] sm:$0xff] %v347_v37  ;;  %350 = vst [vmem:[%s2530_s24 + $0x130] sm:$0xff] %v349_v38 }
  0x4e   : >> { %352 = vst [vmem:[%s2530_s24 + $0x138] sm:$0xff] %v351_v39  ;;  %s4109_s24 = smov %s359_s5 }
  0x4f PF: > { %2257 = sdivrem.u32 %s195_s22, 24 }
  0x50   : > { %s2016_s6 = smul.u32 3072, %s2703_s23 }
  0x52   : > { %s364_s7 = sshra.s32 %s2016_s6, 4 }
  0x53   : > { %s2830_s8 = scalar_lea.vmem %s2688_s9, %s364_s7   ;;  %s2833_s30 = scalar_lea.vmem %s2692_s11, %s364_s7 [#allocation6]  }
  0x58   : > { %s2835_s5 = spop.drf %2257 }
  0x59   : > { %p2018_p1 = scmp.le.s32.totalorder %s2835_s5, 0 }
  0x5a   : > { %s4112_s24 = smov (!%p2018_p1), %s2833_s30  ;;  %s2548_s26 = smov (!%p2018_p1), %s2830_s8  }
  0x5b   : > { %1923 = sbr.rel (%p2018_p1) target bundleno = 104 (0x68), region = 178  ;;  %s2552_s27 = smov (!%p2018_p1), 0  }
  0x5c   : > { %s2556_s28 = smov (!%p2018_p1), 0  }
  0x60 LB: >> { %v380_v40 = vld [vmem:[%s2550_s26] sm:$0xff]  ;;  %v382_v41 = vld [vmem:[%s2550_s26 + $0x68] sm:$0xff]  ;;  %v384_v42 = vld [vmem:[%s2550_s26 + $0xd0] sm:$0xff]  ;;  %s386_s22 = sadd.s32 1, %s2554_s27  ;;  %s374_s28 = sadd.s32 1, %s2558_s28   ;;  %s2558_s28 = sphi %s2556_s28, %s374_s28   ;;  %s2554_s27 = sphi %s2552_s27, %s2553_s27   ;;  %s2550_s26 = sphi %s2548_s26, %s391_s26   ;;  %s2546_s24 = sphi %s4112_s24, %s392_s24  }
  0x61   : >> { %381 = vst [vmem:[%s2546_s24] sm:$0xff] %v380_v40  ;;  %383 = vst [vmem:[%s2546_s24 + $0x40] sm:$0xff] %v382_v41  ;;  %p387_p2 = scmp.ge.s32.totalorder %s386_s22, %s2835_s5  ;;  %p373_p3 = scmp.ge.s32.totalorder %s374_s28, %s2835_s5 }
  0x62   : >> { %385 = vst [vmem:[%s2546_s24 + $0x80] sm:$0xff] %v384_v42 }
  0x63   : >> { %s4260_s22 = smov (%p387_p2, %s386_s22), 0  ;;  %376 = sbr.rel (!%p373_p3) target bundleno = 96 (0x60), region = 184 }
  0x64   : >> { %s2019_s23 = sshll.u32 %s4260_s22, 3  ;;  %s2553_s27 = smov %s4260_s22  }
  0x65   : >> { %s391_s26 = scalar_lea.vmem %s2830_s8, %s2019_s23   ;;  %s392_s24 = scalar_lea.vmem %s2833_s30, %s2019_s23 [#allocation6]  }
  0x68 PF: > { %395 = sbr.rel (%p191_p10) target bundleno = 177 (0xb1), region = 65  ;;  %s397_s29 = ssub.s32 (!%p191_p10), %s2690_s10, %s2696_s21 }
  0x69   : > { %s401_s4 = sshrl.u32 (!%p191_p10), %s2690_s10, 3  ;;  %s2855_s6 = scalar_lea.vmem (!%p191_p10), %s2688_s9, %s397_s29 }
  0x6a   : > { %s2858_s7 = scalar_lea.vmem (!%p191_p10), %s2692_s11, %s397_s29 [#allocation6]  ;;  %2259 = sdivrem.u32 (!%p191_p10), %s401_s4, 24 }
  0x73   : > { %s2862_s24 = spop.drf %2259 }
  0x74   : > { %p2021_p4 = scmp.le.s32.totalorder %s2862_s24, 0 }
  0x75   : > { %s4113_s8 = smov (!%p2021_p4), %s2692_s11  ;;  %s4114_s30 = smov (!%p2021_p4), %s2688_s9 }
  0x76   : > { %1937 = sbr.rel (%p2021_p4) target bundleno = 145 (0x91), region = 189  ;;  %s2871_s5 = smov (!%p2021_p4), 0  }
  0x77   : > { %s2873_s26 = smov (!%p2021_p4), 0  }
  0x7b LB: >> { %v441_v43 = vld [vmem:[%s2566_s30 + $0x68] sm:$0xff]  ;;  %v443_v44 = vld [vmem:[%s2566_s30 + $0x70] sm:$0xff]  ;;  %v445_v45 = vld [vmem:[%s2566_s30 + $0x78] sm:$0xff]  ;;  %s559_s27 = sadd.s32 1, %s2570_s5  ;;  %s409_s26 = sadd.s32 1, %s2574_s26   ;;  %s2574_s26 = sphi %s2873_s26, %s409_s26   ;;  %s2570_s5 = sphi %s2871_s5, %s4117_s5   ;;  %s2566_s30 = sphi %s4114_s30, %s4116_s30   ;;  %s2562_s8 = sphi %s4113_s8, %s4115_s8  }
  0x7c   : >> { %v489_v46 = vld [vmem:[%s2566_s30 + $0xd0] sm:$0xff]  ;;  %v491_v47 = vld [vmem:[%s2566_s30 + $0xd8] sm:$0xff]  ;;  %v493_v48 = vld [vmem:[%s2566_s30 + $0xe0] sm:$0xff]  ;;  %464 = vst [vmem:[%s2562_s8 + $0x40] sm:$0xff] %v441_v43  ;;  %p560_p5 = scmp.ge.s32.totalorder %s559_s27, %s2862_s24  ;;  %p408_p6 = scmp.ge.s32.totalorder %s409_s26, %s2862_s24 }
  0x7d   : >> { %466 = vst [vmem:[%s2562_s8 + $0x48] sm:$0xff] %v443_v44  ;;  %468 = vst [vmem:[%s2562_s8 + $0x50] sm:$0xff] %v445_v45  ;;  %v495_v49 = vld [vmem:[%s2566_s30 + $0xe8] sm:$0xff]  ;;  %v497_v50 = vld [vmem:[%s2566_s30 + $0xf0] sm:$0xff] }
  0x7e   : >> { %v499_v51 = vld [vmem:[%s2566_s30 + $0xf8] sm:$0xff]  ;;  %512 = vst [vmem:[%s2562_s8 + $0x80] sm:$0xff] %v489_v46  ;;  %514 = vst [vmem:[%s2562_s8 + $0x88] sm:$0xff] %v491_v47  ;;  %v501_v52 = vld [vmem:[%s2566_s30 + $0x100] sm:$0xff]  ;;  %s4262_s27 = smov (%p560_p5, %s559_s27), 0 }
  0x7f   : >> { %516 = vst [vmem:[%s2562_s8 + $0x90] sm:$0xff] %v493_v48  ;;  %v503_v53 = vld [vmem:[%s2566_s30 + $0x108] sm:$0xff]  ;;  %v505_v54 = vld [vmem:[%s2566_s30 + $0x110] sm:$0xff]  ;;  %518 = vst [vmem:[%s2562_s8 + $0x98] sm:$0xff] %v495_v49  ;;  %s562_s28 = smul.u32 192, %s4262_s27  ;;  %s4117_s5 = smov %s4262_s27 }
  0x80   : >> { %520 = vst [vmem:[%s2562_s8 + $0xa0] sm:$0xff] %v497_v50  ;;  %522 = vst [vmem:[%s2562_s8 + $0xa8] sm:$0xff] %v499_v51  ;;  %v507_v55 = vld [vmem:[%s2566_s30 + $0x118] sm:$0xff]  ;;  %v509_v56 = vld [vmem:[%s2566_s30 + $0x120] sm:$0xff] }
  0x81   : >> { %v415_v57 = vld [vmem:[%s2566_s30] sm:$0xff]  ;;  %524 = vst [vmem:[%s2562_s8 + $0xb0] sm:$0xff] %v501_v52  ;;  %526 = vst [vmem:[%s2562_s8 + $0xb8] sm:$0xff] %v503_v53  ;;  %v417_v58 = vld [vmem:[%s2566_s30 + $0x8] sm:$0xff]  ;;  %s564_s22 = scalar_lea.vmem %s2688_s9, %s562_s28   ;;  %s565_s23 = scalar_lea.vmem %s2692_s11, %s562_s28 [#allocation6]  }
  0x82   : >> { %528 = vst [vmem:[%s2562_s8 + $0xc0] sm:$0xff] %v505_v54  ;;  %416 = vst [vmem:[%s2562_s8] sm:$0xff] %v415_v57  ;;  %v419_v59 = vld [vmem:[%s2566_s30 + $0x10] sm:$0xff]  ;;  %v421_v60 = vld [vmem:[%s2566_s30 + $0x18] sm:$0xff] }
  0x83   : >> { %530 = vst [vmem:[%s2562_s8 + $0xc8] sm:$0xff] %v507_v55  ;;  %532 = vst [vmem:[%s2562_s8 + $0xd0] sm:$0xff] %v509_v56  ;;  %v423_v61 = vld [vmem:[%s2566_s30 + $0x20] sm:$0xff]  ;;  %v425_v62 = vld [vmem:[%s2566_s30 + $0x28] sm:$0xff] }
  0x84   : >> { %418 = vst [vmem:[%s2562_s8 + $0x8] sm:$0xff] %v417_v58  ;;  %420 = vst [vmem:[%s2562_s8 + $0x10] sm:$0xff] %v419_v59  ;;  %v427_v63 = vld [vmem:[%s2566_s30 + $0x30] sm:$0xff]  ;;  %v429_v0 = vld [vmem:[%s2566_s30 + $0x38] sm:$0xff] }
  0x85   : >> { %422 = vst [vmem:[%s2562_s8 + $0x18] sm:$0xff] %v421_v60  ;;  %424 = vst [vmem:[%s2562_s8 + $0x20] sm:$0xff] %v423_v61  ;;  %v469_v1 = vld [vmem:[%s2566_s30 + $0x80] sm:$0xff]  ;;  %v471_v2 = vld [vmem:[%s2566_s30 + $0x88] sm:$0xff] }
  0x86   : >> { %426 = vst [vmem:[%s2562_s8 + $0x28] sm:$0xff] %v425_v62  ;;  %428 = vst [vmem:[%s2562_s8 + $0x30] sm:$0xff] %v427_v63  ;;  %v473_v3 = vld [vmem:[%s2566_s30 + $0x90] sm:$0xff]  ;;  %v475_v4 = vld [vmem:[%s2566_s30 + $0x98] sm:$0xff] }
  0x87   : >> { %430 = vst [vmem:[%s2562_s8 + $0x38] sm:$0xff] %v429_v0  ;;  %470 = vst [vmem:[%s2562_s8 + $0x58] sm:$0xff] %v469_v1  ;;  %v477_v5 = vld [vmem:[%s2566_s30 + $0xa0] sm:$0xff]  ;;  %v533_v6 = vld [vmem:[%s2566_s30 + $0x128] sm:$0xff] }
  0x88   : >> { %472 = vst [vmem:[%s2562_s8 + $0x60] sm:$0xff] %v471_v2  ;;  %474 = vst [vmem:[%s2562_s8 + $0x68] sm:$0xff] %v473_v3  ;;  %v535_v7 = vld [vmem:[%s2566_s30 + $0x130] sm:$0xff]  ;;  %v537_v8 = vld [vmem:[%s2566_s30 + $0x138] sm:$0xff] }
  0x89   : >> { %476 = vst [vmem:[%s2562_s8 + $0x70] sm:$0xff] %v475_v4  ;;  %478 = vst [vmem:[%s2562_s8 + $0x78] sm:$0xff] %v477_v5  ;;  %v539_v9 = vld [vmem:[%s2566_s30 + $0x140] sm:$0xff]  ;;  %v541_v10 = vld [vmem:[%s2566_s30 + $0x148] sm:$0xff] }
  0x8a   : >> { %534 = vst [vmem:[%s2562_s8 + $0xd8] sm:$0xff] %v533_v6  ;;  %536 = vst [vmem:[%s2562_s8 + $0xe0] sm:$0xff] %v535_v7  ;;  %v543_v11 = vld [vmem:[%s2566_s30 + $0x150] sm:$0xff]  ;;  %v545_v12 = vld [vmem:[%s2566_s30 + $0x158] sm:$0xff] }
  0x8b   : >> { %538 = vst [vmem:[%s2562_s8 + $0xe8] sm:$0xff] %v537_v8  ;;  %540 = vst [vmem:[%s2562_s8 + $0xf0] sm:$0xff] %v539_v9  ;;  %v547_v13 = vld [vmem:[%s2566_s30 + $0x160] sm:$0xff]  ;;  %v549_v14 = vld [vmem:[%s2566_s30 + $0x168] sm:$0xff] }
  0x8c   : >> { %542 = vst [vmem:[%s2562_s8 + $0xf8] sm:$0xff] %v541_v10  ;;  %544 = vst [vmem:[%s2562_s8 + $0x100] sm:$0xff] %v543_v11  ;;  %v551_v15 = vld [vmem:[%s2566_s30 + $0x170] sm:$0xff]  ;;  %v553_v16 = vld [vmem:[%s2566_s30 + $0x178] sm:$0xff]  ;;  %411 = sbr.rel (!%p408_p6) target bundleno = 123 (0x7b), region = 195 }
  0x8d   : >> { %546 = vst [vmem:[%s2562_s8 + $0x108] sm:$0xff] %v545_v12  ;;  %548 = vst [vmem:[%s2562_s8 + $0x110] sm:$0xff] %v547_v13  ;;  %v555_v17 = vld [vmem:[%s2566_s30 + $0x180] sm:$0xff]  ;;  %v557_v18 = vld [vmem:[%s2566_s30 + $0x188] sm:$0xff]  ;;  %s4116_s30 = smov %s564_s22 }
  0x8e   : >> { %550 = vst [vmem:[%s2562_s8 + $0x118] sm:$0xff] %v549_v14  ;;  %552 = vst [vmem:[%s2562_s8 + $0x120] sm:$0xff] %v551_v15 }
  0x8f   : >> { %554 = vst [vmem:[%s2562_s8 + $0x128] sm:$0xff] %v553_v16  ;;  %556 = vst [vmem:[%s2562_s8 + $0x130] sm:$0xff] %v555_v17 }
  0x90   : >> { %558 = vst [vmem:[%s2562_s8 + $0x138] sm:$0xff] %v557_v18  ;;  %s4115_s8 = smov %s565_s23 }
  0x91 PF: > { %2261 = sdivrem.u32 %s401_s4, 24 }
  0x92   : > { %s2022_s29 = smul.u32 3072, %s2862_s24 }
  0x94   : > { %s570_s28 = sshra.s32 %s2022_s29, 4 }
  0x95   : > { %s2989_s0 = scalar_lea.vmem %s2688_s9, %s570_s28   ;;  %s2992_s20 = scalar_lea.vmem %s2692_s11, %s570_s28 [#allocation6]  }
  0x9a   : > { %s2994_s23 = spop.drf %2261 }
  0x9b   : > { %p2024_p7 = scmp.le.s32.totalorder %s2994_s23, 0 }
  0x9c   : > { %s4118_s8 = smov (!%p2024_p7), %s2992_s20  ;;  %s2580_s30 = smov (!%p2024_p7), %s2989_s0  }
  0x9d   : > { %1951 = sbr.rel (%p2024_p7) target bundleno = 170 (0xaa), region = 200  ;;  %s2584_s5 = smov (!%p2024_p7), 0  }
  0x9e   : > { %s2588_s26 = smov (!%p2024_p7), 0  }
  0xa2 LB: >> { %v586_v19 = vld [vmem:[%s2582_s30] sm:$0xff]  ;;  %v588_v20 = vld [vmem:[%s2582_s30 + $0x68] sm:$0xff]  ;;  %v590_v21 = vld [vmem:[%s2582_s30 + $0xd0] sm:$0xff]  ;;  %s592_s4 = sadd.s32 1, %s2586_s5  ;;  %s580_s26 = sadd.s32 1, %s2590_s26   ;;  %s2590_s26 = sphi %s2588_s26, %s580_s26   ;;  %s2586_s5 = sphi %s2584_s5, %s2585_s5   ;;  %s2582_s30 = sphi %s2580_s30, %s597_s30   ;;  %s2578_s8 = sphi %s4118_s8, %s598_s8  }
  0xa3   : >> { %587 = vst [vmem:[%s2578_s8] sm:$0xff] %v586_v19  ;;  %589 = vst [vmem:[%s2578_s8 + $0x40] sm:$0xff] %v588_v20  ;;  %p593_p8 = scmp.ge.s32.totalorder %s592_s4, %s2994_s23  ;;  %p579_p9 = scmp.ge.s32.totalorder %s580_s26, %s2994_s23 }
  0xa4   : >> { %591 = vst [vmem:[%s2578_s8 + $0x80] sm:$0xff] %v590_v21 }
  0xa5   : >> { %s4264_s4 = smov (%p593_p8, %s592_s4), 0  ;;  %582 = sbr.rel (!%p579_p9) target bundleno = 162 (0xa2), region = 206 }
  0xa6   : >> { %s2025_s24 = sshll.u32 %s4264_s4, 3  ;;  %s2585_s5 = smov %s4264_s4  }
  0xa7   : >> { %s597_s30 = scalar_lea.vmem %s2989_s0, %s2025_s24   ;;  %s598_s8 = scalar_lea.vmem %s2992_s20, %s2025_s24 [#allocation6]  }
  0xaa PF: > { %s2600_s27 = smov 1  }
  0xab   : > { %s599_s22 = sshll.u32 %s2600_s27, %s2696_s21 }
  0xac   : > { %s2027_s29 = sadd.s32 4294967295, %s599_s22 }
  0xad   : > { %v609_v22 = vld [vmem:[%s2855_s6] sm:%s2027_s29]  ;;  %v611_v23 = vld [vmem:[%s2855_s6 + $0x68] sm:%s2027_s29] }
  0xae   : > { %610 = vst [vmem:[%s2858_s7] sm:%s2027_s29] %v609_v22  ;;  %612 = vst [vmem:[%s2858_s7 + $0x40] sm:%s2027_s29] %v611_v23 }
  0xaf   : > { %v613_v24 = vld [vmem:[%s2855_s6 + $0xd0] sm:%s2027_s29] }
  0xb0   : > { %614 = vst [vmem:[%s2858_s7 + $0x80] sm:%s2027_s29] %v613_v24 }
  0xb1 PF: > { %p2028_p10 = scmp.ge.u32.totalorder %s2690_s10, 8 }
  0xb2   : > { %s2601_s0 = smov (!%p2028_p10), 1  }
  0xb3   : > { %173 = sbr.rel (%p2028_p10) target bundleno = 188 (0xbc), region = 36  ;;  %s174_s20 = sshll.u32 (!%p2028_p10), %s2601_s0, %s2690_s10 }
  0xb4   : > { %s2029_s21 = sadd.s32 (!%p2028_p10), 4294967295, %s174_s20 }
  0xb8   : > { %v184_v25 = vld [vmem:[%s2688_s9] sm:%s2029_s21]  ;;  %v186_v26 = vld [vmem:[%s2688_s9 + $0x68] sm:%s2029_s21] }
  0xb9   : > { %185 = vst [vmem:[%s2692_s11] sm:%s2029_s21] %v184_v25  ;;  %187 = vst [vmem:[%s2692_s11 + $0x40] sm:%s2029_s21] %v186_v26 }
  0xba   : > { %v188_v27 = vld [vmem:[%s2688_s9 + $0xd0] sm:%s2029_s21] }
  0xbb   : > { %189 = vst [vmem:[%s2692_s11 + $0x80] sm:%s2029_s21] %v188_v27 }
  0xbc PF: > { %p2030_p11 = scmp.ge.s32.totalorder %s2526_s18, 1  ;;  %p637_p12 = scmp.lt.s32.totalorder %s2526_s18, 5 }
  0xbe   : > { %p638_p13 = pnand %p2030_p11, %p637_p12 }
  0xc0   : > { %641 = sbr.rel (%p638_p13) target bundleno = 935 (0x3a7), region = 94 }
  0xc5   : > { %v727_v28 = vld [vmem:[%s4040_s2] sm:$0xff]  ;;  %v729_v29 = vld [vmem:[%s4040_s2 + $0x10] sm:$0x7]  ;;  %s644_s9 = sand.u32 1, %s2502_s12   ;;  %v2602_v30 = vmov 0   ;;  %v728_v31 = vld [vmem:[%s4040_s2 + $0x8] sm:$0xff] }
  0xc6   : > { %2263 = vset.pattern.permute.xlu0 %v2602_v30  ;;  %2264 = vset.pattern.permute.xlu1 %v2602_v30  ;;  %s2041_s11 = smul.u32 192, %s644_s9  ;;  %vm4059_vm0 = vcmask 1042432   ;;  %s2032_s12 = sshll.u32 %s2510_s14, 10 }
  0xc7   : > { %1361 = vperm.xlu0 %2263, %v727_v28   ;;  %1371 = vperm.xlu1 %2264, %v729_v29   ;;  %p687_p0 = scmp.lt.s32.totalorder %s2514_s15, 1  ;;  %s3430_s5 = sshll.u32 %s2510_s14, 3 }
  0xc8   : > { %s646_s30 = scalar_lea.vmem [#allocation6], %s2041_s11  ;;  %p689_p1 = scmp.lt.s32.totalorder %s3430_s5, 12 }
  0xc9   : > { %v3035_v32 = vld [vmem:[%s646_s30] sm:$0xff]  ;;  %v3037_v33 = vld [vmem:[%s646_s30 + $0x8] sm:$0xff]  ;;  %v3039_v34 = vld [vmem:[%s646_s30 + $0x10] sm:$0xff]  ;;  %s4266_s15 = smov (!%p687_p0, %s2514_s15), 1  ;;  %s1690_s6 = scalar_lea.vmem [#allocation3], %s3430_s5 }
  0xca   : > { %v3041_v35 = vld [vmem:[%s646_s30 + $0x18] sm:$0xff]  ;;  %v3043_v36 = vld [vmem:[%s646_s30 + $0x20] sm:$0xff]  ;;  %v3045_v37 = vld [vmem:[%s646_s30 + $0x28] sm:$0xff]  ;;  %s2042_s26 = smul.u32 13, %s4266_s15  ;;  %s3857_s21 = scalar_lea.vmem %s4041_s3, %s4266_s15 }
  0xcb   : > { %1366 = vperm.xlu0 %2263, %v728_v31   ;;  %v3047_v38 = vld [vmem:[%s646_s30 + $0x30] sm:$0xff]  ;;  %v3049_v39 = vld [vmem:[%s646_s30 + $0x38] sm:$0xff]  ;;  %v3051_v40 = vld [vmem:[%s646_s30 + $0x40] sm:$0xff]  ;;  %s690_s4 = scalar_select %p689_p1, %s3430_s5, 12 }
  0xcc   : > { %v3053_v41 = vld [vmem:[%s646_s30 + $0x48] sm:$0xff]  ;;  %v3055_v42 = vld [vmem:[%s646_s30 + $0x50] sm:$0xff]  ;;  %v3057_v43 = vld [vmem:[%s646_s30 + $0x58] sm:$0xff]  ;;  %v730_v50 = vmax.f32 %v3035_v32, %v3051_v40  ;;  %s1630_s15 = scalar_lea.vmem [#allocation2], %s3430_s5  ;;  %p2034_p2 = scmp.ne.s32.totalorder %s2510_s14, 0 }
  0xcd   : > { %v3059_v44 = vld [vmem:[%s646_s30 + $0x60] sm:$0xff]  ;;  %v3061_v45 = vld [vmem:[%s646_s30 + $0x68] sm:$0xff]  ;;  %v3063_v46 = vld [vmem:[%s646_s30 + $0x70] sm:$0xff]  ;;  %v740_v51 = vmax.f32 %v3037_v33, %v3053_v41  ;;  %v749_v52 = vmax.f32 %v3039_v34, %v3055_v42  ;;  %v758_v53 = vmax.f32 %v3041_v35, %v3057_v43  ;;  %s692_s24 = sadd.s32 %s2042_s26, %s690_s4 }
  0xce   : > { %v3065_v47 = vld [vmem:[%s646_s30 + $0x78] sm:$0xff]  ;;  %v3067_v48 = vld [vmem:[%s646_s30 + $0x80] sm:$0x7]  ;;  %v3069_v49 = vld [vmem:[%s646_s30 + $0x88] sm:$0x7]  ;;  %v767_v60 = vmax.f32 %v3043_v36, %v3059_v44  ;;  %v776_v61 = vmax.f32 %v3045_v37, %v3061_v45  ;;  %v785_v62 = vmax.f32 %v3047_v38, %v3063_v46  ;;  %s693_s29 = scalar_lea.vmem %s4039_s1, %s692_s24 }
  0xcf   : > { %v3079_v54 = vld [vmem:[%s646_s30 + $0x90] sm:$0x7]  ;;  %v3081_v55 = vld [vmem:[%s646_s30 + $0x98] sm:$0x7]  ;;  %v3083_v56 = vld [vmem:[%s646_s30 + $0xa0] sm:$0x7]  ;;  %v794_v63 = vmax.f32 %v3049_v39, %v3065_v47 }
  0xd0   : > { %v3085_v57 = vld [vmem:[%s646_s30 + $0xa8] sm:$0x7]  ;;  %v3087_v58 = vld [vmem:[%s646_s30 + $0xb0] sm:$0x7]  ;;  %v3089_v59 = vld [vmem:[%s646_s30 + $0xb8] sm:$0x7] }
  0xd1   : > { %v732_v0 = vsel %vm4059_vm0, %v3067_v48, -inf  ;;  %v741_v1 = vsel %vm4059_vm0, %v3069_v49, -inf  ;;  %v750_v2 = vsel %vm4059_vm0, %v3079_v54, -inf  ;;  %v759_v3 = vsel %vm4059_vm0, %v3081_v55, -inf }
  0xd2   : > { %v733_v4 = vmax.f32 %v730_v50, %v732_v0  ;;  %v742_v5 = vmax.f32 %v740_v51, %v741_v1  ;;  %v751_v6 = vmax.f32 %v749_v52, %v750_v2  ;;  %v760_v7 = vmax.f32 %v758_v53, %v759_v3 }
  0xd3   : > { %v768_v8 = vsel %vm4059_vm0, %v3083_v56, -inf  ;;  %v777_v9 = vsel %vm4059_vm0, %v3085_v57, -inf  ;;  %v786_v10 = vsel %vm4059_vm0, %v3087_v58, -inf  ;;  %v795_v11 = vsel %vm4059_vm0, %v3089_v59, -inf }
  0xd4   : > { %v734_v12 = vrot.slane %v733_v4, 4  ;;  %v743_v13 = vrot.slane %v742_v5, 4  ;;  %v752_v14 = vrot.slane %v751_v6, 4  ;;  %v761_v15 = vrot.slane %v760_v7, 4 }
  0xd5   : > { %v769_v16 = vmax.f32 %v767_v60, %v768_v8  ;;  %v778_v17 = vmax.f32 %v776_v61, %v777_v9  ;;  %v787_v18 = vmax.f32 %v785_v62, %v786_v10  ;;  %v796_v19 = vmax.f32 %v794_v63, %v795_v11 }
  0xd6   : > { %v735_v20 = vmax.f32 %v733_v4, %v734_v12  ;;  %v744_v21 = vmax.f32 %v742_v5, %v743_v13  ;;  %v753_v22 = vmax.f32 %v751_v6, %v752_v14  ;;  %v762_v23 = vmax.f32 %v760_v7, %v761_v15 }
  0xd7   : > { %v770_v24 = vrot.slane %v769_v16, 4  ;;  %v779_v25 = vrot.slane %v778_v17, 4  ;;  %v788_v26 = vrot.slane %v787_v18, 4  ;;  %v797_v27 = vrot.slane %v796_v19, 4 }
  0xd8   : > { %v736_v28 = vrot.slane %v735_v20, 2  ;;  %v745_v29 = vrot.slane %v744_v21, 2  ;;  %v754_v30 = vrot.slane %v753_v22, 2  ;;  %v763_v31 = vrot.slane %v762_v23, 2 }
  0xd9   : > { %v771_v50 = vmax.f32 %v769_v16, %v770_v24  ;;  %v780_v51 = vmax.f32 %v778_v17, %v779_v25  ;;  %v789_v52 = vmax.f32 %v787_v18, %v788_v26  ;;  %v798_v53 = vmax.f32 %v796_v19, %v797_v27 }
  0xda   : > { %v737_v60 = vmax.f32 %v735_v20, %v736_v28  ;;  %v746_v61 = vmax.f32 %v744_v21, %v745_v29  ;;  %v755_v62 = vmax.f32 %v753_v22, %v754_v30  ;;  %v764_v63 = vmax.f32 %v762_v23, %v763_v31 }
  0xdb   : > { %v772_v0 = vrot.slane %v771_v50, 2  ;;  %v781_v1 = vrot.slane %v780_v51, 2  ;;  %v790_v2 = vrot.slane %v789_v52, 2  ;;  %v799_v3 = vrot.slane %v798_v53, 2 }
  0xdc   : > { %v738_v4 = vrot.slane %v737_v60, 1  ;;  %v747_v5 = vrot.slane %v746_v61, 1  ;;  %v756_v6 = vrot.slane %v755_v62, 1  ;;  %v765_v7 = vrot.slane %v764_v63, 1 }
  0xdd   : > { %v773_v8 = vmax.f32 %v771_v50, %v772_v0  ;;  %v782_v9 = vmax.f32 %v780_v51, %v781_v1  ;;  %v791_v10 = vmax.f32 %v789_v52, %v790_v2  ;;  %v800_v11 = vmax.f32 %v798_v53, %v799_v3 }
  0xde   : > { %v739_v12 = vmax.f32 %v737_v60, %v738_v4  ;;  %v748_v13 = vmax.f32 %v746_v61, %v747_v5  ;;  %v757_v14 = vmax.f32 %v755_v62, %v756_v6  ;;  %v766_v18 = vmax.f32 %v764_v63, %v765_v7 }
  0xdf   : > { %v774_v15 = vrot.slane %v773_v8, 1  ;;  %v783_v16 = vrot.slane %v782_v9, 1  ;;  %v792_v17 = vrot.slane %v791_v10, 1  ;;  %v801_v19 = vrot.slane %v800_v11, 1 }
  0xe0   : > { %v3116_v23 = vsub.f32 %v3035_v32, %v739_v12  ;;  %v3119_v24 = vsub.f32 %v3037_v33, %v748_v13  ;;  %v3122_v25 = vsub.f32 %v3039_v34, %v757_v14  ;;  %v3125_v27 = vsub.f32 %v3041_v35, %v766_v18 }
  0xe1   : > { %v775_v20 = vmax.f32 %v773_v8, %v774_v15  ;;  %v784_v21 = vmax.f32 %v782_v9, %v783_v16  ;;  %v793_v22 = vmax.f32 %v791_v10, %v792_v17  ;;  %v802_v26 = vmax.f32 %v800_v11, %v801_v19 }
  0xe2   : > { %v827_v32 = vmul.f32 1.442695, %v3116_v23  ;;  %v829_v33 = vmul.f32 1.442695, %v3119_v24  ;;  %v831_v34 = vmul.f32 1.442695, %v3122_v25  ;;  %v3152_v51 = vsub.f32 %v3055_v42, %v757_v14 }
  0xe3   : > { %v3128_v28 = vsub.f32 %v3043_v36, %v775_v20  ;;  %v3131_v29 = vsub.f32 %v3045_v37, %v784_v21  ;;  %v3134_v30 = vsub.f32 %v3047_v38, %v793_v22  ;;  %v3140_v31 = vsub.f32 %v3049_v39, %v802_v26 }
  0xe4   : > { %v833_v35 = vmul.f32 1.442695, %v3125_v27  ;;  %v3144_v36 = vsub.f32 %v3051_v40, %v739_v12  ;;  %2265 = vpow2.f32 %v827_v32  ;;  %v3148_v38 = vsub.f32 %v3053_v41, %v748_v13  ;;  %4120 = vst [vmem:[#allocation9_spill] sm:$0xff] %v3152_v51 }
  0xe5   : > { %v835_v37 = vmul.f32 1.442695, %v3128_v28  ;;  %2267 = vpow2.f32 %v829_v33  ;;  %v837_v50 = vmul.f32 1.442695, %v3131_v29  ;;  %v839_v39 = vmul.f32 1.442695, %v3134_v30 }
  0xe6   : > { %4119 = vst [vmem:[#allocation8_spill] sm:$0xff] %v3148_v38  ;;  %2269 = vpow2.f32 %v831_v34  ;;  %v3156_v52 = vsub.f32 %v3057_v43, %v766_v18  ;;  %v841_v40 = vmul.f32 1.442695, %v3140_v31  ;;  %v3160_v53 = vsub.f32 %v3059_v44, %v775_v20 }
  0xe7   : > { %2271 = vpow2.f32 %v833_v35  ;;  %v843_v41 = vmul.f32 1.442695, %v3144_v36  ;;  %v3164_v60 = vsub.f32 %v3061_v45, %v784_v21  ;;  %v845_v42 = vmul.f32 1.442695, %v3148_v38 }
  0xe8   : > { %4121 = vst [vmem:[#allocation10_spill] sm:$0xff] %v3156_v52  ;;  %4122 = vst [vmem:[#allocation11_spill] sm:$0xff] %v3160_v53  ;;  %2273 = vpow2.f32 %v835_v37  ;;  %v3168_v61 = vsub.f32 %v3063_v46, %v793_v22  ;;  %v847_v43 = vmul.f32 1.442695, %v3152_v51  ;;  %v3172_v62 = vsub.f32 %v3065_v47, %v802_v26 }
  0xe9   : > { %4123 = vst [vmem:[#allocation12_spill] sm:$0xff] %v3164_v60  ;;  %2275 = vpow2.f32 %v837_v50  ;;  %v849_v44 = vmul.f32 1.442695, %v3156_v52  ;;  %v3176_v63 = vsub.f32 %v3067_v48, %v739_v12  ;;  %v851_v45 = vmul.f32 1.442695, %v3160_v53 }
  0xea   : > { %4124 = vst [vmem:[#allocation13_spill] sm:$0xff] %v3168_v61  ;;  %2277 = vpow2.f32 %v839_v39  ;;  %4125 = vst [vmem:[#allocation14_spill] sm:$0xff] %v3172_v62  ;;  %v3180_v0 = vsub.f32 %v3069_v49, %v748_v13  ;;  %v853_v46 = vmul.f32 1.442695, %v3164_v60  ;;  %v3184_v1 = vsub.f32 %v3079_v54, %v757_v14 }
  0xeb   : > { %2279 = vpow2.f32 %v841_v40  ;;  %4126 = vst [vmem:[#allocation15_spill] sm:$0xff] %v3176_v63  ;;  %v855_v47 = vmul.f32 1.442695, %v3168_v61  ;;  %v3188_v2 = vsub.f32 %v3081_v55, %v766_v18  ;;  %v857_v48 = vmul.f32 1.442695, %v3172_v62 }
  0xec   : > { %2281 = vpow2.f32 %v843_v41  ;;  %4127 = vst [vmem:[#allocation16_spill] sm:$0xff] %v3180_v0  ;;  %4128 = vst [vmem:[#allocation17_spill] sm:$0xff] %v3184_v1  ;;  %v3192_v3 = vsub.f32 %v3083_v56, %v775_v20  ;;  %v859_v49 = vmul.f32 1.442695, %v3176_v63  ;;  %v3196_v5 = vsub.f32 %v3085_v57, %v784_v21 }
  0xed   : > { %2283 = vpow2.f32 %v845_v42  ;;  %4129 = vst [vmem:[#allocation18_spill] sm:$0xff] %v3188_v2  ;;  %v861_v54 = vmul.f32 1.442695, %v3180_v0  ;;  %v3200_v55 = vsub.f32 %v3087_v58, %v793_v22  ;;  %v863_v7 = vmul.f32 1.442695, %v3184_v1 }
  0xee   : > { %2285 = vpow2.f32 %v847_v43  ;;  %4130 = vst [vmem:[#allocation19_spill] sm:$0xff] %v3192_v3  ;;  %4131 = vst [vmem:[#allocation20_spill] sm:$0xff] %v3196_v5  ;;  %v865_v56 = vmul.f32 1.442695, %v3188_v2  ;;  %v3205_v10 = vsub.f32 %v3089_v59, %v802_v26  ;;  %v867_v57 = vmul.f32 1.442695, %v3192_v3 }
  0xef   : > { %2287 = vpow2.f32 %v849_v44  ;;  %4132 = vst [vmem:[#allocation21_spill] sm:$0xff] %v3200_v55  ;;  %v869_v12 = vmul.f32 1.442695, %v3196_v5  ;;  %v871_v13 = vmul.f32 1.442695, %v3200_v55  ;;  %v4043_v19 = vlaneseq }
  0xf0   : > { %2289 = vpow2.f32 %v851_v45  ;;  %4133 = vst [vmem:[#allocation22_spill] sm:$0xff] %v3205_v10  ;;  %v873_v16 = vmul.f32 1.442695, %v3205_v10  ;;  %v3215_v34 = vstv %s2032_s12 }
  0xf1   : > { %v2266_v4 = vpop.eup %2265  ;;  %2291 = vpow2.f32 %v853_v46  ;;  %v3213_v33 = vand.u32 127, %v4043_v19 }
  0xf2   : > { %v2268_v6 = vpop.eup %2267  ;;  %2293 = vpow2.f32 %v855_v47  ;;  %v963_v50 = vmul.f32 %v2266_v4, %v2266_v4 }
  0xf3   : > { %v2270_v8 = vpop.eup %2269  ;;  %2295 = vpow2.f32 %v857_v48  ;;  %v964_v39 = vmul.f32 %v2268_v6, %v2268_v6 }
  0xf4   : > { %v2272_v9 = vpop.eup %2271  ;;  %2297 = vpow2.f32 %v859_v49  ;;  %v965_v40 = vmul.f32 %v2270_v8, %v2270_v8 }
  0xf5   : > { %v2274_v11 = vpop.eup %2273  ;;  %2299 = vpow2.f32 %v861_v54  ;;  %v966_v43 = vmul.f32 %v2272_v9, %v2272_v9 }
  0xf6   : > { %v2276_v58 = vpop.eup %2275  ;;  %2301 = vpow2.f32 %v863_v7  ;;  %v967_v44 = vmul.f32 %v2274_v11, %v2274_v11 }
  0xf7   : > { %v2278_v14 = vpop.eup %2277  ;;  %2303 = vpow2.f32 %v865_v56  ;;  %v968_v45 = vmul.f32 %v2276_v58, %v2276_v58 }
  0xf8   : > { %v2280_v15 = vpop.eup %2279  ;;  %2305 = vpow2.f32 %v867_v57  ;;  %v969_v49 = vmul.f32 %v2278_v14, %v2278_v14 }
  0xf9   : > { %v2282_v59 = vpop.eup %2281  ;;  %2307 = vpow2.f32 %v869_v12  ;;  %v3220_v54 = vmul.f32 %v2280_v15, %v2280_v15 }
  0xfa   : > { %v2284_v17 = vpop.eup %2283  ;;  %2309 = vpow2.f32 %v871_v13  ;;  %v875_v32 = vadd.f32 %v2282_v59, %v2266_v4  ;;  %v971_v57 = vmul.f32 %v2282_v59, %v2282_v59 }
  0xfb   : > { %v2286_v18 = vpop.eup %2285  ;;  %2311 = vpow2.f32 %v873_v16  ;;  %v884_v37 = vadd.f32 %v2284_v17, %v2268_v6  ;;  %v972_v19 = vmul.f32 %v2284_v17, %v2284_v17 }
  0xfc   : > { %v2288_v20 = vpop.eup %2287  ;;  %v893_v42 = vadd.f32 %v2286_v18, %v2270_v8  ;;  %v973_v0 = vmul.f32 %v2286_v18, %v2286_v18 }
  0xfd   : > { %v2290_v21 = vpop.eup %2289  ;;  %v902_v48 = vadd.f32 %v2288_v20, %v2272_v9 }
  0xfe   : > { %v2292_v22 = vpop.eup %2291  ;;  %v911_v6 = vadd.f32 %v2290_v21, %v2274_v11  ;;  %v975_v60 = vmul.f32 %v2290_v21, %v2290_v21  ;;  %v1005_v38 = vadd.f32 %v973_v0, %v965_v40 }
  0xff   : > { %v2294_v26 = vpop.eup %2293  ;;  %v920_v16 = vadd.f32 %v2292_v22, %v2276_v58  ;;  %v976_v53 = vmul.f32 %v2292_v22, %v2292_v22 }
 0x100   : > { %v2296_v35 = vpop.eup %2295  ;;  %v929_v3 = vadd.f32 %v2294_v26, %v2278_v14  ;;  %v974_v14 = vmul.f32 %v2288_v20, %v2288_v20 }
 0x101   : > { %v2298_v41 = vpop.eup %2297  ;;  %v938_v62 = vadd.f32 %v2296_v35, %v2280_v15 }
 0x102   : > { %v3217_v46 = vpop.eup %2299  ;;  %v876_v47 = vsel %vm4059_vm0, %v2298_v41, 0.0 }
 0x103   : > { %v2302_v7 = vpop.eup %2301  ;;  %v877_v56 = vadd.f32 %v876_v47, %v875_v32  ;;  %v885_v4 = vsel %vm4059_vm0, %v3217_v46, 0.0  ;;  %v980_v0 = vmul.f32 %v3217_v46, %v3217_v46 }
 0x104   : > { %v2304_v12 = vpop.eup %2303  ;;  %v886_v8 = vadd.f32 %v885_v4, %v884_v37  ;;  %v894_v13 = vsel %vm4059_vm0, %v2302_v7, 0.0 }
 0x105   : > { %v2306_v10 = vpop.eup %2305  ;;  %v878_v55 = vrot.slane %v877_v56, 4  ;;  %v895_v5 = vadd.f32 %v894_v13, %v893_v42  ;;  %v903_v9 = vsel %vm4059_vm0, %v2304_v12, 0.0  ;;  %v987_v42 = vadd.f32 %v971_v57, %v963_v50 }
 0x106   : > { %v2308_v2 = vpop.eup %2307  ;;  %v887_v1 = vrot.slane %v886_v8, 4  ;;  %v904_v32 = vadd.f32 %v903_v9, %v902_v48  ;;  %v912_v47 = vsel %vm4059_vm0, %v2306_v10, 0.0  ;;  %v978_v50 = vmul.f32 %v2296_v35, %v2296_v35 }
 0x107   : > { %v2310_v11 = vpop.eup %2309  ;;  %v879_v59 = vadd.f32 %v878_v55, %v877_v56  ;;  %v896_v63 = vrot.slane %v895_v5, 4  ;;  %v913_v37 = vadd.f32 %v912_v47, %v911_v6  ;;  %v921_v4 = vsel %vm4059_vm0, %v2308_v2, 0.0 }
 0x108   : > { %v922_v58 = vadd.f32 %v921_v4, %v920_v16  ;;  %v930_v17 = vsel %vm4059_vm0, %v2310_v11, 0.0  ;;  %v2312_v13 = vpop.eup %2311  ;;  %v888_v9 = vadd.f32 %v887_v1, %v886_v8  ;;  %v905_v52 = vrot.slane %v904_v32, 4 }
 0x109   : > { %v931_v61 = vadd.f32 %v930_v17, %v929_v3  ;;  %v880_v48 = vrot.slane %v879_v59, 2  ;;  %v939_v18 = vsel %vm4059_vm0, %v2312_v13, 0.0  ;;  %v897_v55 = vadd.f32 %v896_v63, %v895_v5 }
 0x10a   : > { %v914_v56 = vrot.slane %v913_v37, 4  ;;  %v923_v6 = vrot.slane %v922_v58, 4  ;;  %v977_v47 = vmul.f32 %v2294_v26, %v2294_v26  ;;  %v940_v51 = vadd.f32 %v939_v18, %v938_v62 }
 0x10b   : > { %v979_v16 = vmul.f32 %v2298_v41, %v2298_v41  ;;  %v996_v4 = vadd.f32 %v972_v19, %v964_v39  ;;  %v932_v15 = vrot.slane %v931_v61, 4  ;;  %v1014_v57 = vadd.f32 %v974_v14, %v966_v43 }
 0x10c   : > { %v1023_v3 = vadd.f32 %v975_v60, %v967_v44  ;;  %v3230_v20 = vadd.f32 %v880_v48, %v879_v59  ;;  %v889_v21 = vrot.slane %v888_v9, 2  ;;  %v3232_v22 = vadd.f32 %v905_v52, %v904_v32 }
 0x10d   : > { %v1032_v1 = vadd.f32 %v976_v53, %v968_v45  ;;  %v898_v8 = vrot.slane %v897_v55, 2  ;;  %v3234_v17 = vadd.f32 %v914_v56, %v913_v37  ;;  %v3236_v63 = vadd.f32 %v923_v6, %v922_v58 }
 0x10e   : > { %v1041_v5 = vadd.f32 %v977_v47, %v969_v49  ;;  %v941_v62 = vrot.slane %v940_v51, 4  ;;  %v981_v19 = vmul.f32 %v2302_v7, %v2302_v7  ;;  %v988_v26 = vsel %vm4059_vm0, %v979_v16, 0.0 }
 0x10f   : > { %v3241_v60 = vadd.f32 %v932_v15, %v931_v61  ;;  %v982_v35 = vmul.f32 %v2304_v12, %v2304_v12  ;;  %v983_v39 = vmul.f32 %v2306_v10, %v2306_v10  ;;  %v1050_v52 = vadd.f32 %v978_v50, %v3220_v54 }
 0x110   : > { %v882_v53 = vrot.slane %v3230_v20, 1  ;;  %v3245_v40 = vadd.f32 %v889_v21, %v888_v9  ;;  %v907_v41 = vrot.slane %v3232_v22, 2  ;;  %v984_v43 = vmul.f32 %v2308_v2, %v2308_v2 }
 0x111   : > { %v3248_v44 = vadd.f32 %v898_v8, %v897_v55  ;;  %v916_v45 = vrot.slane %v3234_v17, 2  ;;  %v925_v46 = vrot.slane %v3236_v63, 2  ;;  %v989_v49 = vadd.f32 %v988_v26, %v987_v42 }
 0x112   : > { %v3252_v61 = vadd.f32 %v941_v62, %v940_v51  ;;  %v985_v7 = vmul.f32 %v2310_v11, %v2310_v11  ;;  %v997_v10 = vsel %vm4059_vm0, %v980_v0, 0.0  ;;  %v1006_v54 = vsel %vm4059_vm0, %v981_v19, 0.0 }
 0x113   : > { %v934_v12 = vrot.slane %v3241_v60, 2  ;;  %v990_v32 = vrot.slane %v989_v49, 4  ;;  %v998_v59 = vadd.f32 %v997_v10, %v996_v4  ;;  %v1007_v37 = vadd.f32 %v1006_v54, %v1005_v38 }
 0x114   : > { %v986_v2 = vmul.f32 %v2312_v13, %v2312_v13  ;;  %v1015_v58 = vsel %vm4059_vm0, %v982_v35, 0.0  ;;  %v1024_v14 = vsel %vm4059_vm0, %v983_v39, 0.0  ;;  %v1033_v48 = vsel %vm4059_vm0, %v984_v43, 0.0 }
 0x115   : > { %v991_v42 = vadd.f32 %v990_v32, %v989_v49  ;;  %v999_v51 = vrot.slane %v998_v59, 4  ;;  %v1008_v9 = vrot.slane %v1007_v37, 4  ;;  %v1016_v11 = vadd.f32 %v1015_v58, %v1014_v57 }
 0x116   : > { %v943_v18 = vrot.slane %v3252_v61, 2  ;;  %v1025_v55 = vadd.f32 %v1024_v14, %v1023_v3  ;;  %v1034_v56 = vadd.f32 %v1033_v48, %v1032_v1  ;;  %v1042_v6 = vsel %vm4059_vm0, %v985_v7, 0.0 }
 0x117   : > { %v992_v47 = vrot.slane %v991_v42, 2  ;;  %v1000_v16 = vadd.f32 %v999_v51, %v998_v59  ;;  %v1009_v38 = vadd.f32 %v1008_v9, %v1007_v37  ;;  %v1017_v13 = vrot.slane %v1016_v11, 4 }
 0x118   : > { %v1026_v4 = vrot.slane %v1025_v55, 4  ;;  %v1035_v15 = vrot.slane %v1034_v56, 4  ;;  %v1043_v50 = vadd.f32 %v1042_v6, %v1041_v5  ;;  %v1051_v21 = vsel %vm4059_vm0, %v986_v2, 0.0 }
 0x119   : > { %v993_v8 = vadd.f32 %v992_v47, %v991_v42  ;;  %v1001_v62 = vrot.slane %v1000_v16, 2  ;;  %v1010_v0 = vrot.slane %v1009_v38, 2  ;;  %v1018_v19 = vadd.f32 %v1017_v13, %v1016_v11 }
 0x11a   : > { %v1027_v57 = vadd.f32 %v1026_v4, %v1025_v55  ;;  %v1036_v26 = vadd.f32 %v1035_v15, %v1034_v56  ;;  %v1044_v35 = vrot.slane %v1043_v50, 4  ;;  %v1052_v3 = vadd.f32 %v1051_v21, %v1050_v52 }
 0x11b   : > { %v994_v1 = vrot.slane %v993_v8, 1  ;;  %v1002_v39 = vadd.f32 %v1001_v62, %v1000_v16  ;;  %v1011_v43 = vadd.f32 %v1010_v0, %v1009_v38  ;;  %v1019_v49 = vrot.slane %v1018_v19, 2 }
 0x11c   : > { %v1028_v7 = vrot.slane %v1027_v57, 2  ;;  %v1037_v10 = vrot.slane %v1036_v26, 2  ;;  %v1045_v54 = vadd.f32 %v1044_v35, %v1043_v50  ;;  %v1053_v32 = vrot.slane %v1052_v3, 4 }
 0x11d   : > { %v3263_v59 = vadd.f32 %v994_v1, %v993_v8  ;;  %v1003_v5 = vrot.slane %v1002_v39, 1  ;;  %v1012_v37 = vrot.slane %v1011_v43, 1  ;;  %v1020_v2 = vadd.f32 %v1019_v49, %v1018_v19 }
 0x11e   : > { %v1029_v58 = vadd.f32 %v1028_v7, %v1027_v57  ;;  %v1038_v14 = vadd.f32 %v1037_v10, %v1036_v26  ;;  %v1046_v48 = vrot.slane %v1045_v54, 2  ;;  %v1054_v42 = vadd.f32 %v1053_v32, %v1052_v3 }
 0x11f   : > { %v3265_v51 = vadd.f32 %v1003_v5, %v1002_v39  ;;  %v3267_v52 = vadd.f32 %v1012_v37, %v1011_v43  ;;  %v1021_v9 = vrot.slane %v1020_v2, 1  ;;  %2313 = vrsqrt.f32 %v3263_v59 }
 0x120   : > { %v1030_v11 = vrot.slane %v1029_v58, 1  ;;  %v1039_v55 = vrot.slane %v1038_v14, 1  ;;  %v1047_v56 = vadd.f32 %v1046_v48, %v1045_v54  ;;  %v1055_v6 = vrot.slane %v1054_v42, 2 }
 0x121   : > { %v891_v47 = vrot.slane %v3245_v40, 1  ;;  %v900_v16 = vrot.slane %v3248_v44, 1  ;;  %v908_v38 = vadd.f32 %v907_v41, %v3232_v22  ;;  %v3275_v13 = vadd.f32 %v1021_v9, %v1020_v2 }
 0x122   : > { %v917_v4 = vadd.f32 %v916_v45, %v3234_v17  ;;  %v3280_v15 = vadd.f32 %v1030_v11, %v1029_v58  ;;  %v1048_v50 = vrot.slane %v1047_v56, 1  ;;  %v1056_v21 = vadd.f32 %v1055_v6, %v1054_v42 }
 0x123   : > { %v926_v8 = vadd.f32 %v925_v46, %v3236_v63  ;;  %v935_v62 = vadd.f32 %v934_v12, %v3241_v60  ;;  %v3288_v0 = vadd.f32 %v1039_v55, %v1038_v14  ;;  %2315 = vrsqrt.f32 %v3265_v51 }
 0x124   : > { %v944_v22 = vadd.f32 %v943_v18, %v3252_v61  ;;  %v3292_v41 = vadd.f32 %v1048_v50, %v1047_v56  ;;  %v1057_v17 = vrot.slane %v1056_v21, 1  ;;  %2317 = vrsqrt.f32 %v3267_v52 }
 0x125   : > { %v909_v45 = vrot.slane %v908_v38, 1  ;;  %2319 = vrsqrt.f32 %v3275_v13  ;;  %v1497_v63 = vadd.s32 128, %v3213_v33  ;;  %v1498_v46 = vadd.s32 256, %v3213_v33 }
 0x126   : > { %v3301_v60 = vadd.f32 %v882_v53, %v3230_v20  ;;  %v918_v12 = vrot.slane %v917_v4, 1  ;;  %v3303_v19 = vadd.f32 %v1057_v17, %v1056_v21  ;;  %2321 = vrsqrt.f32 %v3280_v15 }
 0x127   : > { %v3307_v61 = vadd.f32 %v891_v47, %v3245_v40  ;;  %v927_v18 = vrot.slane %v926_v8, 1  ;;  %2323 = vrsqrt.f32 %v3288_v0  ;;  %v3311_v57 = vadd.s32 384, %v3213_v33 }
 0x128   : > { %v3314_v26 = vadd.f32 %v900_v16, %v3248_v44  ;;  %v936_v35 = vrot.slane %v935_v62, 1  ;;  %v945_v20 = vrot.slane %v944_v22, 1  ;;  %2325 = vrsqrt.f32 %v3292_v41 }
 0x129   : > { %v3317_v53 = vadd.f32 %v909_v45, %v908_v38  ;;  %2327 = vrsqrt.f32 %v3303_v19  ;;  %v3321_v40 = vadd.s32 512, %v3213_v33  ;;  %v3324_v3 = vadd.s32 640, %v3213_v33 }
 0x12a   : > { %v3326_v1 = vadd.f32 %v918_v12, %v917_v4  ;;  %2329 = vrcp.f32 %v3301_v60  ;;  %v3330_v44 = vadd.s32 768, %v3213_v33  ;;  %v3333_v39 = vadd.s32 896, %v3213_v33 }
 0x12b   : > { %v3335_v43 = vadd.f32 %v927_v18, %v926_v8  ;;  %2331 = vrcp.f32 %v3307_v61  ;;  %v3340_v49 = vadd.s32 %v3215_v34, %v3213_v33  ;;  %v3343_v7 = vadd.s32 %v3215_v34, %v1497_v63 }
 0x12c   : > { %v2314_v10 = vpop.eup %2313  ;;  %v3345_v54 = vadd.f32 %v936_v35, %v935_v62  ;;  %v3347_v32 = vadd.f32 %v945_v20, %v944_v22  ;;  %2333 = vrcp.f32 %v3314_v26  ;;  %v3351_v5 = vadd.s32 %v3215_v34, %v1498_v46 }
 0x12d   : > { %4134 = vst [vmem:[#allocation23_spill] sm:$0xff] %v3340_v49  ;;  %4135 = vst [vmem:[#allocation24_spill] sm:$0xff] %v3343_v7  ;;  %vm1061_vm1 = vcmp.eq.f32.partialorder %v3263_v59, inf  ;;  %vm1063_vm2 = vcmp.eq.f32.partialorder %v3263_v59, 0.0  ;;  %v1064_v33 = vand.u32 2147483648, %v3263_v59  ;;  %2335 = vrcp.f32 %v3317_v53 }
 0x12e   : > { %4136 = vst [vmem:[#allocation25_spill] sm:$0xff] %v3351_v5  ;;  %v1060_v37 = vmul.f32 %v2314_v10, %v3263_v59  ;;  %vm1068_vm3 = vcmp.eq.f32.partialorder %v3265_v51, inf  ;;  %vm1070_vm4 = vcmp.eq.f32.partialorder %v3265_v51, 0.0  ;;  %2337 = vrcp.f32 %v3326_v1 }
 0x12f   : > { %v1071_v2 = vand.u32 2147483648, %v3265_v51  ;;  %vm1075_vm5 = vcmp.eq.f32.partialorder %v3267_v52, inf  ;;  %vm1077_vm6 = vcmp.eq.f32.partialorder %v3267_v52, 0.0  ;;  %2339 = vrcp.f32 %v3335_v43 }
 0x130   : > { %v2316_v58 = vpop.eup %2315  ;;  %v1078_v14 = vand.u32 2147483648, %v3267_v52  ;;  %vm1082_vm7 = vcmp.eq.f32.partialorder %v3275_v13, inf  ;;  %vm1084_vm8 = vcmp.eq.f32.partialorder %v3275_v13, 0.0  ;;  %2341 = vrcp.f32 %v3345_v54 }
 0x131   : > { %v2318_v48 = vpop.eup %2317  ;;  %v1067_v42 = vmul.f32 %v2316_v58, %v3265_v51  ;;  %v1085_v9 = vand.u32 2147483648, %v3275_v13  ;;  %vm1089_vm9 = vcmp.eq.f32.partialorder %v3280_v15, inf  ;;  %2343 = vrcp.f32 %v3347_v32 }
 0x132   : > { %v2320_v11 = vpop.eup %2319  ;;  %v1062_v55 = vsel %vm1061_vm1, %v3263_v59, %v1060_v37  ;;  %v1074_v56 = vmul.f32 %v2318_v48, %v3267_v52  ;;  %vm1091_vm10 = vcmp.eq.f32.partialorder %v3280_v15, 0.0  ;;  %v1092_v6 = vand.u32 2147483648, %v3280_v15 }
 0x133   : > { %v2322_v47 = vpop.eup %2321  ;;  %v1069_v16 = vsel %vm1068_vm3, %v3265_v51, %v1067_v42  ;;  %v1081_v38 = vmul.f32 %v2320_v11, %v3275_v13  ;;  %vm1096_vm11 = vcmp.eq.f32.partialorder %v3288_v0, inf  ;;  %vm1098_vm12 = vcmp.eq.f32.partialorder %v3288_v0, 0.0 }
 0x134   : > { %v2324_v4 = vpop.eup %2323  ;;  %v1076_v50 = vsel %vm1075_vm5, %v3267_v52, %v1074_v56  ;;  %v1088_v21 = vmul.f32 %v2322_v47, %v3280_v15  ;;  %v1099_v8 = vand.u32 2147483648, %v3288_v0  ;;  %vm1103_vm13 = vcmp.eq.f32.partialorder %v3292_v41, inf }
 0x135   : > { %v2326_v62 = vpop.eup %2325  ;;  %v1065_v22 = vsel %vm1063_vm2, %v1064_v33, %v1062_v55  ;;  %v1083_v17 = vsel %vm1082_vm7, %v3275_v13, %v1081_v38  ;;  %v1095_v45 = vmul.f32 %v2324_v4, %v3288_v0  ;;  %vm1105_vm14 = vcmp.eq.f32.partialorder %v3292_v41, 0.0 }
 0x136   : > { %v2328_v63 = vpop.eup %2327  ;;  %v1072_v46 = vsel %vm1070_vm4, %v1071_v2, %v1069_v16  ;;  %v1090_v12 = vsel %vm1089_vm9, %v3280_v15, %v1088_v21  ;;  %v1102_v18 = vmul.f32 %v2326_v62, %v3292_v41  ;;  %vm1110_vm15 = vcmp.eq.f32.partialorder %v3303_v19, inf }
 0x137   : > { %v2330_v59 = vpop.eup %2329  ;;  %v1079_v35 = vsel %vm1077_vm6, %v1078_v14, %v1076_v50  ;;  %v1097_v20 = vsel %vm1096_vm11, %v3288_v0, %v1095_v45  ;;  %v1106_v51 = vand.u32 2147483648, %v3292_v41  ;;  %v1109_v10 = vmul.f32 %v2328_v63, %v3303_v19 }
 0x138   : > { %v2332_v33 = vpop.eup %2331  ;;  %v1086_v37 = vsel %vm1084_vm8, %v1085_v9, %v1083_v17  ;;  %v1104_v2 = vsel %vm1103_vm13, %v3292_v41, %v1102_v18  ;;  %v1113_v52 = vand.u32 2147483648, %v3303_v19  ;;  %v1116_v58 = vmul.f32 %v2330_v59, %v1065_v22 }
 0x139   : > { %v2334_v14 = vpop.eup %2333  ;;  %v1093_v48 = vsel %vm1091_vm10, %v1092_v6, %v1090_v12  ;;  %v1111_v42 = vsel %vm1110_vm15, %v3303_v19, %v1109_v10  ;;  %vm1112_vm1 = vcmp.eq.f32.partialorder %v3303_v19, 0.0  ;;  %v1118_v11 = vmul.f32 %v2332_v33, %v1072_v46 }
 0x13a   : > { %v2336_v13 = vpop.eup %2335  ;;  %v1100_v9 = vsel %vm1098_vm12, %v1099_v8, %v1097_v20  ;;  %v1120_v55 = vmul.f32 %v2334_v14, %v1079_v35  ;;  %v1131_v56 = vmul.f32 0.31622776, %v1116_v58  ;;  %v3427_v47 = vadd.s32 %v3215_v34, %v3311_v57 }
 0x13b   : > { %v2338_v15 = vpop.eup %2337  ;;  %v1107_v6 = vsel %vm1105_vm14, %v1106_v51, %v1104_v2  ;;  %v1122_v16 = vmul.f32 %v2336_v13, %v1086_v37  ;;  %v1132_v38 = vmul.f32 0.31622776, %v1118_v11  ;;  %v3436_v4 = vadd.s32 %v3215_v34, %v3321_v40 }
 0x13c   : > { %4137 = vst [vmem:[#allocation26_spill] sm:$0xff] %v3427_v47  ;;  %v2340_v0 = vpop.eup %2339  ;;  %v1114_v57 = vsel %vm1112_vm1, %v1113_v52, %v1111_v42  ;;  %v1124_v50 = vmul.f32 %v2338_v15, %v1093_v48  ;;  %v1133_v21 = vmul.f32 0.31622776, %v1120_v55  ;;  %v1139_v8 = vmin.f32 %v1131_v56, 0.99999905 }
 0x13d   : > { %4138 = vst [vmem:[#allocation27_spill] sm:$0xff] %v3436_v4  ;;  %v2342_v41 = vpop.eup %2341  ;;  %v1126_v62 = vmul.f32 %v2340_v0, %v1100_v9  ;;  %v1134_v22 = vmul.f32 0.31622776, %v1122_v16  ;;  %v1140_v17 = vmin.f32 %v1132_v38, 0.99999905  ;;  %v3446_v40 = vadd.s32 %v3215_v34, %v3324_v3  ;;  %v726_v0 = vld [vmem:[%s693_s29] sm:$0xff] }
 0x13e   : > { %v2344_v45 = vpop.eup %2343  ;;  %v1128_v63 = vmul.f32 %v2342_v41, %v1107_v6  ;;  %v1135_v46 = vmul.f32 0.31622776, %v1124_v50  ;;  %v1141_v12 = vmin.f32 %v1133_v21, 0.99999905  ;;  %v3451_v19 = vadd.s32 %v3215_v34, %v3330_v44 }
 0x13f   : > { %4139 = vst [vmem:[#allocation28_spill] sm:$0xff] %v3446_v40  ;;  %v1130_v18 = vmul.f32 %v2344_v45, %v1114_v57  ;;  %v1136_v59 = vmul.f32 0.31622776, %v1126_v62  ;;  %v1142_v35 = vmin.f32 %v1134_v22, 0.99999905  ;;  %v3456_v20 = vadd.s32 %v3215_v34, %v3333_v39 }
 0x140   : > { %4140 = vst [vmem:[#allocation29_spill] sm:$0xff] %v3451_v19  ;;  %v1137_v51 = vmul.f32 0.31622776, %v1128_v63  ;;  %v1143_v3 = vmin.f32 %v1135_v46, 0.99999905  ;;  %v3458_v10 = vadd.f32 1.0, %v1139_v8  ;;  %v4142_v56 = vlaneseq }
 0x141   : > { %4141 = vst [vmem:[#allocation30_spill] sm:$0xff] %v3456_v20  ;;  %v1155_v33 = vsub.f32 1.0, %v1139_v8  ;;  %v1138_v37 = vmul.f32 0.31622776, %v1130_v18  ;;  %v1144_v2 = vmin.f32 %v1136_v59, 0.99999905 }
 0x142   : > { %v3460_v52 = vadd.f32 1.0, %v1140_v17  ;;  %v1156_v44 = vsub.f32 1.0, %v1140_v17  ;;  %v1145_v58 = vmin.f32 %v1137_v51, 0.99999905  ;;  %v3462_v14 = vadd.f32 1.0, %v1141_v12 }
 0x143   : > { %v3464_v48 = vadd.f32 1.0, %v1142_v35  ;;  %v1157_v42 = vsub.f32 1.0, %v1141_v12  ;;  %v1146_v34 = vmin.f32 %v1138_v37, 0.99999905  ;;  %v3469_v39 = vadd.f32 1.0, %v1143_v3 }
 0x144   : > { %v3471_v11 = vadd.f32 1.0, %v1144_v2  ;;  %v1158_v13 = vsub.f32 1.0, %v1142_v35  ;;  %v1159_v9 = vsub.f32 1.0, %v1143_v3  ;;  %v1160_v55 = vsub.f32 1.0, %v1144_v2 }
 0x145   : > { %2345 = vrcp.f32 %v1155_v33  ;;  %v3474_v15 = vshrl.u32 %v4142_v56, 7  ;;  %v3476_v6 = vadd.f32 1.0, %v1145_v58  ;;  %v3478_v16 = vadd.f32 1.0, %v1146_v34 }
 0x146   : > { %v1161_v38 = vsub.f32 1.0, %v1145_v58  ;;  %2347 = vrcp.f32 %v1156_v44  ;;  %v1162_v57 = vsub.f32 1.0, %v1146_v34 }
 0x147   : > { %2349 = vrcp.f32 %v1157_v42  ;;  %v3481_v50 = vadd.s32 8, %v3474_v15  ;;  %v3484_v21 = vsub.s32 0, %v3474_v15  ;;  %v4077_v8 = vsub.s32 1, %v3474_v15 }
 0x148   : > { %2351 = vrcp.f32 %v1158_v13  ;;  %v4075_v41 = vsub.s32 2, %v3474_v15  ;;  %v4073_v62 = vsub.s32 3, %v3474_v15  ;;  %v4072_v17 = vsub.s32 4, %v3474_v15 }
 0x149   : > { %4143 = vst [vmem:[#allocation31_spill] sm:$0xff] %v3484_v21  ;;  %2353 = vrcp.f32 %v1159_v9  ;;  %v3490_v22 = vrot.slane %v726_v0, %v3484_v21  ;;  %v4070_v45 = vsub.s32 5, %v3474_v15  ;;  %v3496_v63 = vrot.slane %v726_v0, %v4077_v8  ;;  %v4144_v9 = vld [vmem:[#allocation8_spill] sm:$0xff] }
 0x14a   : > { %2355 = vrcp.f32 %v1160_v55  ;;  %v3500_v46 = vrot.slane %v726_v0, %v4075_v41  ;;  %v3504_v12 = vrot.slane %v726_v0, %v4073_v62  ;;  %v3508_v18 = vrot.slane %v726_v0, %v4072_v17 }
 0x14b   : > { %2357 = vrcp.f32 %v1161_v38  ;;  %v3512_v59 = vrot.slane %v726_v0, %v4070_v45  ;;  %v4069_v35 = vsub.s32 6, %v3474_v15  ;;  %v3516_v51 = vadd.s32 16, %v3474_v15 }
 0x14c   : > { %2359 = vrcp.f32 %v1162_v57  ;;  %v4067_v3 = vsub.s32 7, %v3474_v15  ;;  %vm1239_vm2 = vcmp.eq.s32.totalorder %v3490_v22, %v3474_v15  ;;  %vm1240_vm3 = vcmp.eq.s32.totalorder %v3496_v63, %v3474_v15  ;;  %v4148_v57 = vld [vmem:[#allocation11_spill] sm:$0xff] }
 0x14d   : > { %2361 = vlog2.f32 %v3301_v60  ;;  %v3524_v33 = vrot.slane %v726_v0, %v4069_v35  ;;  %vm1241_vm4 = vcmp.eq.s32.totalorder %v3500_v46, %v3474_v15  ;;  %vm1242_vm5 = vcmp.eq.s32.totalorder %v3504_v12, %v3474_v15 }
 0x14e   : > { %2363 = vlog2.f32 %v3307_v61  ;;  %v3533_v37 = vrot.slane %v726_v0, %v4067_v3  ;;  %vm1243_vm6 = vcmp.eq.s32.totalorder %v3508_v18, %v3474_v15  ;;  %vm4065_vm7 = vcmp.eq.s32.totalorder %v3512_v59, %v3474_v15 }
 0x14f   : > { %2365 = vlog2.f32 %v3314_v26  ;;  %vm4064_vm8 = vcmp.eq.s32.totalorder %v3524_v33, %v3474_v15  ;;  %vm4061_vm9 = vcmp.eq.s32.totalorder %v3490_v22, %v3481_v50  ;;  %vm4062_vm11 = vcmp.eq.s32.totalorder %v3496_v63, %v3481_v50 }
 0x150   : > { %2367 = vlog2.f32 %v3317_v53  ;;  %vm4060_vm10 = vcmp.eq.s32.totalorder %v3533_v37, %v3474_v15  ;;  %vm4063_vm13 = vcmp.eq.s32.totalorder %v3504_v12, %v3481_v50  ;;  %vm4076_vm15 = vcmp.eq.s32.totalorder %v3496_v63, %v3516_v51 }
 0x151   : > { %2369 = vlog2.f32 %v3326_v1  ;;  %vm4071_vm12 = vcmp.eq.s32.totalorder %v3508_v18, %v3516_v51  ;;  %vm4066_vm0 = vcmp.eq.s32.totalorder %v3512_v59, %v3516_v51  ;;  %vm4068_vm14 = vcmp.eq.s32.totalorder %v3524_v33, %v3516_v51 }
 0x152   : > { %v2346_v60 = vpop.eup %2345  ;;  %2371 = vlog2.f32 %v3335_v43  ;;  %vm4074_vm1 = vcmp.eq.s32.totalorder %v3533_v37, %v3516_v51  ;;  %v1271_v13 = vsel %vm4061_vm9, %v3144_v36, 0.0  ;;  %vm1513_vm9 = vcmp.lt.s32.totalorder %v3340_v49, 1600 }
 0x153   : > { %v2348_v61 = vpop.eup %2347  ;;  %v1164_v26 = vmul.f32 %v2346_v60, %v3458_v10  ;;  %2373 = vlog2.f32 %v3345_v54 }
 0x154   : > { %v2350_v53 = vpop.eup %2349  ;;  %v1166_v1 = vmul.f32 %v2348_v61, %v3460_v52  ;;  %2375 = vlog2.f32 %v3347_v32  ;;  %v1263_v32 = vsel %vm1239_vm2, %v3116_v23, 0.0  ;;  %v1264_v52 = vsel %vm1240_vm3, %v3119_v24, 0.0  ;;  %v4150_v61 = vld [vmem:[#allocation12_spill] sm:$0xff] }
 0x155   : > { %v2352_v43 = vpop.eup %2351  ;;  %v1168_v54 = vmul.f32 %v2350_v53, %v3462_v14  ;;  %2377 = vlog2.f32 %v1164_v26  ;;  %v1265_v14 = vsel %vm1241_vm4, %v3122_v25, 0.0  ;;  %v3609_v24 = vsel %vm1243_vm6, %v3128_v28, 0.0 }
 0x156   : > { %v2354_v10 = vpop.eup %2353  ;;  %v1170_v2 = vmul.f32 %v2352_v43, %v3464_v48  ;;  %2379 = vlog2.f32 %v1166_v1  ;;  %v1266_v48 = vsel %vm1242_vm5, %v3125_v27, 0.0  ;;  %v3615_v25 = vsel %vm4065_vm7, %v3131_v29, 0.0  ;;  %v4152_v43 = vld [vmem:[#allocation13_spill] sm:$0xff] }
 0x157   : > { %v2356_v44 = vpop.eup %2355  ;;  %v1172_v58 = vmul.f32 %v2354_v10, %v3469_v39  ;;  %2381 = vlog2.f32 %v1168_v54  ;;  %v3622_v27 = vsel %vm4064_vm8, %v3134_v30, 0.0  ;;  %v3628_v28 = vsel %vm4060_vm10, %v3140_v31, 0.0  ;;  %v4145_v31 = vld [vmem:[#allocation9_spill] sm:$0xff]  ;;  %v4154_v10 = vld [vmem:[#allocation14_spill] sm:$0xff] }
 0x158   : > { %v2358_v23 = vpop.eup %2357  ;;  %v1174_v42 = vmul.f32 %v2356_v44, %v3471_v11  ;;  %2383 = vlog2.f32 %v1170_v2  ;;  %v1272_v30 = vsel %vm4062_vm11, %v4144_v9, 0.0  ;;  %vm4146_vm10 = vcmp.eq.s32.totalorder %v3500_v46, %v3481_v50  ;;  %v4156_v44 = vld [vmem:[#allocation15_spill] sm:$0xff]  ;;  %v4161_v9 = vld [vmem:[#allocation18_spill] sm:$0xff] }
 0x159   : > { %v2360_v34 = vpop.eup %2359  ;;  %v1176_v39 = vmul.f32 %v2358_v23, %v3476_v6  ;;  %2385 = vlog2.f32 %v1172_v58  ;;  %v1273_v6 = vsel %vm4146_vm10, %v4145_v31, 0.0  ;;  %vm4149_vm11 = vcmp.eq.s32.totalorder %v3508_v18, %v3481_v50 }
 0x15a   : > { %v2362_v11 = vpop.eup %2361  ;;  %v1178_v29 = vmul.f32 %v2360_v34, %v3478_v16  ;;  %2387 = vlog2.f32 %v1174_v42  ;;  %v4147_v16 = vld [vmem:[#allocation10_spill] sm:$0xff]  ;;  %v1275_v60 = vsel %vm4149_vm11, %v4148_v57, 0.0  ;;  %vm4151_vm10 = vcmp.eq.s32.totalorder %v3512_v59, %v3481_v50  ;;  %v4158_v34 = vld [vmem:[#allocation16_spill] sm:$0xff] }
 0x15b   : > { %v2364_v55 = vpop.eup %2363  ;;  %2389 = vlog2.f32 %v1176_v39  ;;  %v3639_v56 = vmul.f32 0.6931472, %v2362_v11  ;;  %v1274_v38 = vsel %vm4063_vm13, %v4147_v16, 0.0  ;;  %v3660_v26 = vsel %vm4151_vm10, %v4150_v61, 0.0  ;;  %v4159_v11 = vld [vmem:[#allocation17_spill] sm:$0xff]  ;;  %v4165_v61 = vld [vmem:[#allocation20_spill] sm:$0xff] }
 0x15c   : > { %v2366_v36 = vpop.eup %2365  ;;  %2391 = vlog2.f32 %v1178_v29  ;;  %v3650_v0 = vmul.f32 0.6931472, %v2364_v55  ;;  %vm1514_vm13 = vcmp.lt.s32.totalorder %v3343_v7, 1600  ;;  %vm4153_vm8 = vcmp.eq.s32.totalorder %v3524_v33, %v3481_v50 }
 0x15d   : > { %v2368_v53 = vpop.eup %2367  ;;  %v3663_v1 = vmul.f32 0.6931472, %v2366_v36  ;;  %v3669_v54 = vsel %vm4153_vm8, %v4152_v43, 0.0  ;;  %vm4155_vm11 = vcmp.eq.s32.totalorder %v3533_v37, %v3481_v50  ;;  %vm4157_vm10 = vcmp.eq.s32.totalorder %v3490_v22, %v3516_v51  ;;  %v4164_v36 = vld [vmem:[#allocation19_spill] sm:$0xff]  ;;  %v4166_v43 = vld [vmem:[#allocation21_spill] sm:$0xff] }
 0x15e   : > { %v3675_v2 = vsel %vm4155_vm11, %v4154_v10, 0.0  ;;  %v1279_v58 = vsel %vm4157_vm10, %v4156_v44, 0.0  ;;  %v2370_v23 = vpop.eup %2369  ;;  %vm1515_vm7 = vcmp.lt.s32.totalorder %v3351_v5, 1600  ;;  %v3682_v42 = vmul.f32 0.6931472, %v2368_v53 }
 0x15f   : > { %v1280_v39 = vsel %vm4076_vm15, %v4158_v34, 0.0  ;;  %vm4160_vm8 = vcmp.eq.s32.totalorder %v3500_v46, %v3516_v51  ;;  %vm4162_vm11 = vcmp.eq.s32.totalorder %v3504_v12, %v3516_v51  ;;  %v2372_v31 = vpop.eup %2371  ;;  %vm1516_vm10 = vcmp.lt.s32.totalorder %v3427_v47, 1600  ;;  %v4168_v34 = vld [vmem:[#allocation22_spill] sm:$0xff] }
 0x160   : > { %v1281_v29 = vsel %vm4160_vm8, %v4159_v11, 0.0  ;;  %v1282_v55 = vsel %vm4162_vm11, %v4161_v9, 0.0  ;;  %v3697_v16 = vmul.f32 0.6931472, %v2370_v23  ;;  %v3703_v57 = vsel %vm4071_vm12, %v4164_v36, 0.0  ;;  %v2374_v44 = vpop.eup %2373 }
 0x161   : > { %v3709_v53 = vsel %vm4066_vm0, %v4165_v61, 0.0  ;;  %v3715_v10 = vsel %vm4068_vm14, %v4166_v43, 0.0  ;;  %vm1517_vm8 = vcmp.lt.s32.totalorder %v3436_v4, 1600  ;;  %v3718_v23 = vmul.f32 0.6931472, %v2372_v31  ;;  %v2376_v61 = vpop.eup %2375 }
 0x162   : > { %4163 = vst [vmem:[#allocation8_spill] sm:$0xff] %v3697_v16  ;;  %v3724_v11 = vsel %vm4074_vm1, %v4168_v34, 0.0  ;;  %v1287_v9 = vadd.f32 %v1271_v13, %v1263_v32  ;;  %vm4169_vm11 = vcmask 1042432   ;;  %vm1518_vm0 = vcmp.lt.s32.totalorder %v3446_v40, 1600  ;;  %v2378_v31 = vpop.eup %2377 }
 0x163   : > { %4167 = vst [vmem:[#allocation9_spill] sm:$0xff] %v3718_v23  ;;  %v1288_v36 = vsel %vm4169_vm11, %v1279_v58, 0.0  ;;  %v3728_v3 = vmul.f32 0.6931472, %v2374_v44  ;;  %v1296_v43 = vadd.f32 %v1272_v30, %v1264_v52  ;;  %vm4171_vm14 = vmmov %vm4169_vm11  ;;  %v1305_v45 = vadd.f32 %v1273_v6, %v1265_v14  ;;  %v2380_v13 = vpop.eup %2379 }
 0x164   : > { %v1297_v35 = vsel %vm4171_vm14, %v1280_v39, 0.0  ;;  %vm1519_vm12 = vcmp.lt.s32.totalorder %v3451_v19, 1600  ;;  %v3732_v17 = vmul.f32 0.6931472, %v2376_v61  ;;  %v1289_v62 = vadd.f32 %v1288_v36, %v1287_v9  ;;  %vm4173_vm1 = vmmov %vm4169_vm11  ;;  %v2382_v30 = vpop.eup %2381 }
 0x165   : > { %4170 = vst [vmem:[#allocation10_spill] sm:$0xff] %v3728_v3  ;;  %v1306_v34 = vsel %vm4173_vm1, %v1281_v29, 0.0  ;;  %v1314_v32 = vadd.f32 %v1274_v38, %v1266_v48  ;;  %v1180_v58 = vmul.f32 0.6931472, %v2378_v31  ;;  %vm1520_vm11 = vcmp.lt.s32.totalorder %v3456_v20, 1600  ;;  %vm4174_vm15 = vmmov %vm4173_vm1  ;;  %v2384_v61 = vpop.eup %2383 }
 0x166   : > { %4172 = vst [vmem:[#allocation11_spill] sm:$0xff] %v3732_v17  ;;  %v1298_v41 = vadd.f32 %v1297_v35, %v1296_v43  ;;  %v1307_v44 = vadd.f32 %v1306_v34, %v1305_v45  ;;  %v1315_v52 = vsel %vm4174_vm15, %v1282_v55, 0.0  ;;  %v1182_v39 = vmul.f32 0.6931472, %v2380_v13  ;;  %v2386_v38 = vpop.eup %2385  ;;  %vm4183_vm14 = vmmov %vm4173_vm1 }
 0x167   : > { %v1290_v14 = vrot.slane %v1289_v62, 4  ;;  %v1316_v6 = vadd.f32 %v1315_v52, %v1314_v32  ;;  %v1323_v8 = vadd.f32 %v1275_v60, %v3609_v24  ;;  %v1184_v21 = vmul.f32 0.6931472, %v2382_v30  ;;  %v2388_v43 = vpop.eup %2387  ;;  %vm4184_vm15 = vmmov %vm4173_vm1 }
 0x168   : > { %v3738_v9 = vmul.f32 3.1622777, %v1180_v58  ;;  %v1299_v29 = vrot.slane %v1298_v41, 4  ;;  %v1308_v48 = vrot.slane %v1307_v44, 4  ;;  %v1186_v36 = vmul.f32 0.6931472, %v2384_v61  ;;  %v2390_v32 = vpop.eup %2389 }
 0x169   : > { %v3740_v31 = vmul.f32 3.1622777, %v1182_v39  ;;  %v1291_v35 = vadd.f32 %v1290_v14, %v1289_v62  ;;  %v1317_v45 = vrot.slane %v1316_v6, 4  ;;  %v1188_v55 = vmul.f32 0.6931472, %v2386_v38  ;;  %v2392_v52 = vpop.eup %2391 }
 0x16a   : > { %4175 = vst [vmem:[#allocation12_spill] sm:$0xff] %v3738_v9  ;;  %v3742_v34 = vmul.f32 3.1622777, %v1184_v21  ;;  %v1538_v24 = vsel %vm1513_vm9, %v3738_v9, -inf  ;;  %v1521_v60 = vsel %vm1513_vm9, %v3738_v9, inf  ;;  %v1300_v3 = vadd.f32 %v1299_v29, %v1298_v41 }
 0x16b   : > { %4176 = vst [vmem:[#allocation13_spill] sm:$0xff] %v3740_v31  ;;  %v1190_v13 = vmul.f32 0.6931472, %v2388_v43  ;;  %v3750_v58 = vmul.f32 3.1622777, %v1186_v36  ;;  %v1539_v62 = vsel %vm1514_vm13, %v3740_v31, -inf  ;;  %v1309_v19 = vadd.f32 %v1308_v48, %v1307_v44 }
 0x16c   : > { %4177 = vst [vmem:[#allocation14_spill] sm:$0xff] %v3742_v34  ;;  %v1522_v21 = vsel %vm1514_vm13, %v3740_v31, inf  ;;  %v1192_v30 = vmul.f32 0.6931472, %v2390_v32  ;;  %v3758_v39 = vmul.f32 3.1622777, %v1188_v55 }
 0x16d   : > { %4178 = vst [vmem:[#allocation15_spill] sm:$0xff] %v3750_v58  ;;  %v1540_v14 = vsel %vm1515_vm7, %v3742_v34, -inf  ;;  %v1523_v61 = vsel %vm1515_vm7, %v3742_v34, inf  ;;  %v1194_v38 = vmul.f32 0.6931472, %v2392_v52  ;;  %v1541_v43 = vsel %vm1516_vm10, %v3750_v58, -inf }
 0x16e   : > { %4179 = vst [vmem:[#allocation16_spill] sm:$0xff] %v3758_v39  ;;  %v3766_v36 = vmul.f32 3.1622777, %v1190_v13  ;;  %v1524_v55 = vsel %vm1516_vm10, %v3750_v58, inf  ;;  %v3774_v32 = vmul.f32 3.1622777, %v1192_v30 }
 0x16f   : > { %v1542_v7 = vsel %vm1517_vm8, %v3758_v39, -inf  ;;  %v1525_v52 = vsel %vm1517_vm8, %v3758_v39, inf  ;;  %v1292_v13 = vrot.slane %v1291_v35, 2  ;;  %v3782_v5 = vmul.f32 3.1622777, %v1194_v38 }
 0x170   : > { %4180 = vst [vmem:[#allocation17_spill] sm:$0xff] %v3766_v36  ;;  %4181 = vst [vmem:[#allocation18_spill] sm:$0xff] %v3774_v32  ;;  %v1543_v34 = vsel %vm1518_vm0, %v3766_v36, -inf  ;;  %v1546_v31 = vmax.f32 %v1538_v24, %v1542_v7  ;;  %v1526_v30 = vsel %vm1518_vm0, %v3766_v36, inf  ;;  %v1544_v47 = vsel %vm1519_vm12, %v3774_v32, -inf }
 0x171   : > { %4182 = vst [vmem:[#allocation19_spill] sm:$0xff] %v3782_v5  ;;  %v1547_v58 = vmax.f32 %v1539_v62, %v1543_v34  ;;  %v1527_v4 = vsel %vm1519_vm12, %v3774_v32, inf  ;;  %v1529_v38 = vmin.f32 %v1521_v60, %v1525_v52  ;;  %v1545_v39 = vsel %vm1520_vm11, %v3782_v5, -inf }
 0x172   : > { %v1548_v49 = vmax.f32 %v1540_v14, %v1544_v47  ;;  %v1528_v7 = vsel %vm1520_vm11, %v3782_v5, inf  ;;  %v1530_v24 = vmin.f32 %v1522_v21, %v1526_v30  ;;  %v1549_v36 = vmax.f32 %v1541_v43, %v1545_v39 }
 0x173   : > { %v1550_v40 = vmax.f32 %v1546_v31, %v1547_v58  ;;  %v1531_v9 = vmin.f32 %v1523_v61, %v1527_v4  ;;  %v1532_v17 = vmin.f32 %v1524_v55, %v1528_v7  ;;  %v1293_v62 = vadd.f32 %v1292_v13, %v1291_v35  ;;  %v1362_v31 = vpop.permute.xlu0 %1361 }
 0x174   : > { %v1533_v34 = vmin.f32 %v1529_v38, %v1530_v24  ;;  %v1551_v32 = vmax.f32 %v1548_v49, %v1549_v36  ;;  %v1318_v52 = vadd.f32 %v1317_v45, %v1316_v6  ;;  %v1324_v23 = vsel %vm4183_vm14, %v3703_v57, 0.0  ;;  %vm4185_vm14 = vmmov %vm4173_vm1 }
 0x175   : > { %v1534_v60 = vmin.f32 %v1531_v9, %v1532_v17  ;;  %v1294_v47 = vrot.slane %v1293_v62, 1  ;;  %v1301_v14 = vrot.slane %v1300_v3, 2  ;;  %v1310_v16 = vrot.slane %v1309_v19, 2 }
 0x176   : > { %v1325_v20 = vadd.f32 %v1324_v23, %v1323_v8  ;;  %v1552_v5 = vmax.f32 %v1550_v40, %v1551_v32  ;;  %v1319_v39 = vrot.slane %v1318_v52, 2  ;;  %v1332_v4 = vadd.f32 %v3660_v26, %v3615_v25 }
 0x177   : > { %v1535_v21 = vmin.f32 %v1533_v34, %v1534_v60  ;;  %v3806_v35 = vadd.f32 %v1294_v47, %v1293_v62  ;;  %v1302_v41 = vadd.f32 %v1301_v14, %v1300_v3  ;;  %v1311_v49 = vadd.f32 %v1310_v16, %v1309_v19  ;;  %v1367_v45 = vpop.permute.xlu0 %1366  ;;  %v1372_v60 = vpop.permute.xlu1 %1371 }
 0x178   : > { %v1326_v17 = vrot.slane %v1325_v20, 4  ;;  %1553 = vmax.xlane.f32.xlu0 %v1552_v5  ;;  %v1320_v44 = vadd.f32 %v1319_v39, %v1318_v52  ;;  %v1333_v57 = vsel %vm4184_vm15, %v3709_v53, 0.0  ;;  %v1341_v40 = vadd.f32 %v3669_v54, %v3622_v27 }
 0x179   : > { %1536 = vmin.xlane.f32.xlu1 %v1535_v21  ;;  %v1342_v8 = vsel %vm4173_vm1, %v3715_v10, 0.0  ;;  %v1303_v23 = vrot.slane %v1302_v41, 1  ;;  %v1312_v25 = vrot.slane %v1311_v49, 1  ;;  %v1334_v6 = vadd.f32 %v1333_v57, %v1332_v4 }
 0x17a   : > { %v1327_v26 = vadd.f32 %v1326_v17, %v1325_v20  ;;  %v1321_v9 = vrot.slane %v1320_v44, 1  ;;  %v1343_v3 = vadd.f32 %v1342_v8, %v1341_v40  ;;  %v1350_v5 = vadd.f32 %v3675_v2, %v3628_v28 }
 0x17b   : > { %v1351_v19 = vsel %vm4185_vm14, %v3724_v11, 0.0  ;;  %v3818_v16 = vadd.f32 %v1303_v23, %v1302_v41  ;;  %v3820_v53 = vadd.f32 %v1312_v25, %v1311_v49  ;;  %v1335_v54 = vrot.slane %v1334_v6, 4 }
 0x17c   : > { %v1328_v27 = vrot.slane %v1327_v26, 2  ;;  %v3822_v29 = vadd.f32 %v1321_v9, %v1320_v44  ;;  %v1344_v10 = vrot.slane %v1343_v3, 4  ;;  %v1352_v48 = vadd.f32 %v1351_v19, %v1350_v5 }
 0x17d   : > { %v1374_v20 = vsel %vm1239_vm2, %v1362_v31, 0.0  ;;  %v1336_v28 = vadd.f32 %v1335_v54, %v1334_v6  ;;  %v1375_v2 = vsel %vm1240_vm3, %v1362_v31, 0.0  ;;  %v1376_v11 = vsel %vm1241_vm4, %v1362_v31, 0.0 }
 0x17e   : > { %v1329_v58 = vadd.f32 %v1328_v27, %v1327_v26  ;;  %v1345_v61 = vadd.f32 %v1344_v10, %v1343_v3  ;;  %v1353_v36 = vrot.slane %v1352_v48, 4  ;;  %v1377_v43 = vsel %vm1242_vm5, %v1362_v31, 0.0 }
 0x17f   : > { %v1378_v55 = vsel %vm1243_vm6, %v1362_v31, 0.0  ;;  %v1337_v13 = vrot.slane %v1336_v28, 2  ;;  %vm4186_vm2 = vcmp.eq.s32.totalorder %v3512_v59, %v3474_v15  ;;  %vm4187_vm3 = vcmp.eq.s32.totalorder %v3524_v33, %v3474_v15 }
 0x180   : > { %v1330_v32 = vrot.slane %v1329_v58, 1  ;;  %v1379_v30 = vsel %vm4186_vm2, %v1362_v31, 0.0  ;;  %v1380_v38 = vsel %vm4187_vm3, %v1362_v31, 0.0  ;;  %v1346_v7 = vrot.slane %v1345_v61, 2 }
 0x181   : > { %v1354_v24 = vadd.f32 %v1353_v36, %v1352_v48  ;;  %vm4188_vm4 = vcmp.eq.s32.totalorder %v3533_v37, %v3474_v15  ;;  %vm4189_vm5 = vcmp.eq.s32.totalorder %v3490_v22, %v3481_v50  ;;  %v1338_v47 = vadd.f32 %v1337_v13, %v1336_v28 }
 0x182   : > { %v3848_v34 = vsel %vm4188_vm4, %v1362_v31, 0.0  ;;  %v1382_v62 = vsel %vm4189_vm5, %v1367_v45, 0.0  ;;  %v3859_v52 = vadd.f32 %v1330_v32, %v1329_v58  ;;  %vm4190_vm6 = vcmp.eq.s32.totalorder %v3496_v63, %v3481_v50 }
 0x183   : > { %v1383_v14 = vsel %vm4190_vm6, %v1367_v45, 0.0  ;;  %vm4191_vm15 = vcmp.eq.s32.totalorder %v3500_v46, %v3481_v50  ;;  %v1347_v39 = vadd.f32 %v1346_v7, %v1345_v61  ;;  %v1355_v4 = vrot.slane %v1354_v24, 2 }
 0x184   : > { %v1384_v21 = vsel %vm4191_vm15, %v1367_v45, 0.0  ;;  %vm4192_vm1 = vcmp.eq.s32.totalorder %v3504_v12, %v3481_v50  ;;  %vm4193_vm14 = vcmp.eq.s32.totalorder %v3508_v18, %v3481_v50  ;;  %v1339_v49 = vrot.slane %v1338_v47, 1 }
 0x185   : > { %v1385_v31 = vsel %vm4192_vm1, %v1367_v45, 0.0  ;;  %v1386_v41 = vsel %vm4193_vm14, %v1367_v45, 0.0  ;;  %vm4194_vm2 = vcmp.eq.s32.totalorder %v3512_v59, %v3481_v50  ;;  %vm4195_vm3 = vcmp.eq.s32.totalorder %v3524_v33, %v3481_v50 }
 0x186   : > { %v1387_v17 = vsel %vm4194_vm2, %v1367_v45, 0.0  ;;  %v1388_v44 = vsel %vm4195_vm3, %v1367_v45, 0.0  ;;  %vm4196_vm4 = vcmp.eq.s32.totalorder %v3533_v37, %v3481_v50  ;;  %v1348_v40 = vrot.slane %v1347_v39, 1 }
 0x187   : > { %v1389_v57 = vsel %vm4196_vm4, %v1367_v45, 0.0  ;;  %v1356_v8 = vadd.f32 %v1355_v4, %v1354_v24  ;;  %vm4197_vm5 = vcmp.eq.s32.totalorder %v3490_v22, %v3516_v51  ;;  %vm4198_vm6 = vcmp.eq.s32.totalorder %v3496_v63, %v3516_v51 }
 0x188   : > { %v1390_v23 = vsel %vm4197_vm5, %v1372_v60, 0.0  ;;  %v1391_v25 = vsel %vm4198_vm6, %v1372_v60, 0.0  ;;  %v3888_v26 = vadd.f32 %v1339_v49, %v1338_v47  ;;  %vm4199_vm15 = vcmp.eq.s32.totalorder %v3500_v46, %v3516_v51 }
 0x189   : > { %v1392_v6 = vsel %vm4199_vm15, %v1372_v60, 0.0  ;;  %vm4200_vm1 = vcmp.eq.s32.totalorder %v3504_v12, %v3516_v51  ;;  %vm4201_vm14 = vcmp.eq.s32.totalorder %v3508_v18, %v3516_v51  ;;  %v3899_v22 = vadd.f32 %v1348_v40, %v1347_v39 }
 0x18a   : > { %v1393_v50 = vsel %vm4200_vm1, %v1372_v60, 0.0  ;;  %v1394_v9 = vsel %vm4201_vm14, %v1372_v60, 0.0  ;;  %v1357_v3 = vrot.slane %v1356_v8, 1  ;;  %vm4202_vm2 = vcmp.eq.s32.totalorder %v3512_v59, %v3516_v51 }
 0x18b   : > { %v1395_v63 = vsel %vm4202_vm2, %v1372_v60, 0.0  ;;  %vm4203_vm3 = vcmp.eq.s32.totalorder %v3524_v33, %v3516_v51  ;;  %vm4204_vm4 = vcmp.eq.s32.totalorder %v3533_v37, %v3516_v51  ;;  %v1398_v5 = vadd.f32 %v1382_v62, %v1374_v20 }
 0x18c   : > { %v1396_v46 = vsel %vm4203_vm3, %v1372_v60, 0.0  ;;  %v1397_v12 = vsel %vm4204_vm4, %v1372_v60, 0.0  ;;  %vm4205_vm5 = vcmask 1042432   ;;  %v1407_v18 = vadd.f32 %v1383_v14, %v1375_v2 }
 0x18d   : > { %v1399_v19 = vsel %vm4205_vm5, %v1390_v23, 0.0  ;;  %v3911_v27 = vadd.f32 %v1357_v3, %v1356_v8  ;;  %vm4206_vm6 = vmmov %vm4205_vm5  ;;  %v1416_v10 = vadd.f32 %v1384_v21, %v1376_v11  ;;  %v1425_v58 = vadd.f32 %v1385_v31, %v1377_v43 }
 0x18e   : > { %v1408_v54 = vsel %vm4206_vm6, %v1391_v25, 0.0  ;;  %vm4207_vm15 = vmmov %vm4205_vm5  ;;  %v1400_v48 = vadd.f32 %v1399_v19, %v1398_v5  ;;  %v1434_v61 = vadd.f32 %v1386_v41, %v1378_v55  ;;  %v1443_v37 = vadd.f32 %v1387_v17, %v1379_v30 }
 0x18f   : > { %v1417_v59 = vsel %vm4207_vm15, %v1392_v6, 0.0  ;;  %v1409_v45 = vadd.f32 %v1408_v54, %v1407_v18  ;;  %vm4208_vm1 = vmmov %vm4205_vm5  ;;  %v1452_v24 = vadd.f32 %v1388_v44, %v1380_v38  ;;  %v1461_v41 = vadd.f32 %v1389_v57, %v3848_v34 }
 0x190   : > { %v1426_v33 = vsel %vm4208_vm1, %v1393_v50, 0.0  ;;  %v1418_v28 = vadd.f32 %v1417_v59, %v1416_v10  ;;  %vm4209_vm14 = vmmov %vm4208_vm1  ;;  %v1401_v20 = vrot.slane %v1400_v48, 4 }
 0x191   : > { %v1435_v51 = vsel %vm4209_vm14, %v1394_v9, 0.0  ;;  %v1410_v36 = vrot.slane %v1409_v45, 4  ;;  %v1427_v2 = vadd.f32 %v1426_v33, %v1425_v58  ;;  %vm4210_vm2 = vmmov %vm4208_vm1 }
 0x192   : > { %v1444_v32 = vsel %vm4210_vm2, %v1395_v63, 0.0  ;;  %v1419_v13 = vrot.slane %v1418_v28, 4  ;;  %v1436_v7 = vadd.f32 %v1435_v51, %v1434_v61  ;;  %v1402_v62 = vadd.f32 %v1401_v20, %v1400_v48  ;;  %vm4211_vm3 = vmmov %vm4208_vm1 }
 0x193   : > { %v1445_v11 = vadd.f32 %v1444_v32, %v1443_v37  ;;  %v1411_v60 = vadd.f32 %v1410_v36, %v1409_v45  ;;  %v1428_v47 = vrot.slane %v1427_v2, 4  ;;  %v1453_v43 = vsel %vm4211_vm3, %v1396_v46, 0.0  ;;  %vm4212_vm4 = vmmov %vm4208_vm1 }
 0x194   : > { %v1420_v14 = vadd.f32 %v1419_v13, %v1418_v28  ;;  %v1437_v21 = vrot.slane %v1436_v7, 4  ;;  %v1454_v39 = vadd.f32 %v1453_v43, %v1452_v24  ;;  %v1403_v4 = vrot.slane %v1402_v62, 2 }
 0x195   : > { %v1446_v55 = vrot.slane %v1445_v11, 4  ;;  %v1412_v30 = vrot.slane %v1411_v60, 2  ;;  %v1429_v31 = vadd.f32 %v1428_v47, %v1427_v2  ;;  %v1462_v25 = vsel %vm4212_vm4, %v1397_v12, 0.0 }
 0x196   : > { %v1421_v49 = vrot.slane %v1420_v14, 2  ;;  %v1438_v17 = vadd.f32 %v1437_v21, %v1436_v7  ;;  %v1455_v8 = vrot.slane %v1454_v39, 4  ;;  %v1404_v23 = vadd.f32 %v1403_v4, %v1402_v62 }
 0x197   : > { %v1447_v40 = vadd.f32 %v1446_v55, %v1445_v11  ;;  %v1413_v38 = vadd.f32 %v1412_v30, %v1411_v60  ;;  %v1430_v44 = vrot.slane %v1429_v31, 2  ;;  %v1463_v19 = vadd.f32 %v1462_v25, %v1461_v41  ;;  %v4214_v30 = vld [vmem:[#allocation9_spill] sm:$0xff] }
 0x198   : > { %v1422_v6 = vadd.f32 %v1421_v49, %v1420_v14  ;;  %v1439_v50 = vrot.slane %v1438_v17, 2  ;;  %v1456_v3 = vadd.f32 %v1455_v8, %v1454_v39  ;;  %v1405_v63 = vrot.slane %v1404_v23, 1  ;;  %v4213_v39 = vld [vmem:[#allocation8_spill] sm:$0xff] }
 0x199   : > { %v1448_v9 = vrot.slane %v1447_v40, 2  ;;  %v1414_v46 = vrot.slane %v1413_v38, 1  ;;  %v1431_v5 = vadd.f32 %v1430_v44, %v1429_v31  ;;  %v1464_v45 = vrot.slane %v1463_v19, 4  ;;  %v4219_v44 = vld [vmem:[#allocation13_spill] sm:$0xff] }
 0x19a   : > { %v1423_v18 = vrot.slane %v1422_v6, 1  ;;  %v1440_v54 = vadd.f32 %v1439_v50, %v1438_v17  ;;  %v1457_v57 = vrot.slane %v1456_v3, 2  ;;  %v1406_v10 = vadd.f32 %v1405_v63, %v1404_v23  ;;  %v4216_v23 = vld [vmem:[#allocation11_spill] sm:$0xff] }
 0x19b   : > { %v1449_v34 = vadd.f32 %v1448_v9, %v1447_v40  ;;  %v1415_v59 = vadd.f32 %v1414_v46, %v1413_v38  ;;  %v1432_v48 = vrot.slane %v1431_v5, 1  ;;  %v1465_v51 = vadd.f32 %v1464_v45, %v1463_v19 }
 0x19c   : > { %v1424_v58 = vadd.f32 %v1423_v18, %v1422_v6  ;;  %v1441_v33 = vrot.slane %v1440_v54, 1  ;;  %v1458_v12 = vadd.f32 %v1457_v57, %v1456_v3  ;;  %v1470_v37 = vsub.f32 0.0, %v1406_v10  ;;  %v4221_v6 = vld [vmem:[#allocation14_spill] sm:$0xff]  ;;  %v4223_v3 = vld [vmem:[#allocation15_spill] sm:$0xff] }
 0x19d   : > { %v1450_v28 = vrot.slane %v1449_v34, 1  ;;  %v1433_v61 = vadd.f32 %v1432_v48, %v1431_v5  ;;  %v1471_v20 = vsub.f32 0.0, %v1415_v59  ;;  %v1466_v7 = vrot.slane %v1465_v51, 2 }
 0x19e   : > { %v1442_v36 = vadd.f32 %v1441_v33, %v1440_v54  ;;  %v1459_v32 = vrot.slane %v1458_v12, 1  ;;  %v1472_v13 = vsub.f32 0.0, %v1424_v58  ;;  %v1478_v24 = vsub.f32 %v3806_v35, %v3639_v56  ;;  %v4215_v35 = vld [vmem:[#allocation10_spill] sm:$0xff]  ;;  %v4225_v54 = vld [vmem:[#allocation16_spill] sm:$0xff]  ;;  %v4228_v33 = vld [vmem:[#allocation17_spill] sm:$0xff] }
 0x19f   : > { %v1451_v2 = vadd.f32 %v1450_v28, %v1449_v34  ;;  %v1473_v11 = vsub.f32 0.0, %v1433_v61  ;;  %v1479_v62 = vsub.f32 %v3818_v16, %v3650_v0  ;;  %v1480_v14 = vsub.f32 %v3820_v53, %v3663_v1 }
 0x1a0   : > { %v1460_v60 = vadd.f32 %v1459_v32, %v1458_v12  ;;  %v1474_v47 = vsub.f32 0.0, %v1442_v36  ;;  %v1467_v21 = vadd.f32 %v1466_v7, %v1465_v51  ;;  %v1481_v55 = vsub.f32 %v3822_v29, %v3682_v42  ;;  %v4229_v12 = vld [vmem:[#allocation18_spill] sm:$0xff] }
 0x1a1   : > { %v1475_v43 = vsub.f32 0.0, %v1451_v2  ;;  %v1482_v4 = vsub.f32 %v3859_v52, %v4213_v39  ;;  %v1483_v31 = vsub.f32 %v3888_v26, %v4214_v30  ;;  %v1484_v0 = vsub.f32 %v3899_v22, %v4215_v35  ;;  %v4217_v52 = vld [vmem:[#allocation12_spill] sm:$0xff] }
 0x1a2   : > { %v1476_v56 = vsub.f32 0.0, %v1460_v60  ;;  %v1468_v16 = vrot.slane %v1467_v21, 1  ;;  %v1486_v41 = vmul.f32 %v1478_v24, %v1470_v37  ;;  %v1487_v49 = vmul.f32 %v1479_v62, %v1471_v20  ;;  %v4231_v20 = vld [vmem:[#allocation19_spill] sm:$0xff] }
 0x1a3   : > { %v1488_v17 = vmul.f32 %v1480_v14, %v1472_v13  ;;  %v1489_v40 = vmul.f32 %v1481_v55, %v1473_v11  ;;  %v1490_v1 = vmul.f32 %v1482_v4, %v1474_v47  ;;  %v1491_v53 = vmul.f32 %v1483_v31, %v1475_v43 }
 0x1a4   : > { %v1469_v8 = vadd.f32 %v1468_v16, %v1467_v21  ;;  %v1485_v42 = vsub.f32 %v3911_v27, %v4216_v23  ;;  %v1492_v29 = vmul.f32 %v1484_v0, %v1476_v56  ;;  %v1555_v26 = vsel %vm1513_vm9, %v4217_v52, 0.0 }
 0x1a5   : > { %v1556_v22 = vsel %vm1514_vm13, %v4219_v44, 0.0  ;;  %v1557_v9 = vsel %vm1515_vm7, %v4221_v6, 0.0  ;;  %v1558_v46 = vsel %vm1516_vm10, %v4223_v3, 0.0  ;;  %v1563_v27 = vsel %vm1513_vm9, %v1486_v41, 0.0 }
 0x1a6   : > { %v1477_v5 = vsub.f32 0.0, %v1469_v8  ;;  %v1564_v19 = vsel %vm1514_vm13, %v1487_v49, 0.0  ;;  %v1565_v18 = vsel %vm1515_vm7, %v1488_v17, 0.0  ;;  %v1559_v57 = vsel %vm1517_vm8, %v4225_v54, 0.0 }
 0x1a7   : > { %v1566_v10 = vsel %vm1516_vm10, %v1489_v40, 0.0  ;;  %v1567_v59 = vsel %vm1517_vm8, %v1490_v1, 0.0  ;;  %v1568_v45 = vsel %vm1518_vm0, %v1491_v53, 0.0  ;;  %v1560_v28 = vsel %vm1518_vm0, %v4228_v33, 0.0 }
 0x1a8   : > { %v1493_v58 = vmul.f32 %v1485_v42, %v1477_v5  ;;  %v1561_v51 = vsel %vm1519_vm12, %v4229_v12, 0.0  ;;  %v1569_v37 = vsel %vm1519_vm12, %v1492_v29, 0.0  ;;  %v1562_v2 = vsel %vm1520_vm11, %v4231_v20, 0.0 }
 0x1a9   : > { %v1640_v32 = vcombine.low %v1563_v27, %v1564_v19  ;;  %v1641_v13 = vcombine.low %v1565_v18, %v1566_v10  ;;  %v2603_v11 = vmov 1966171168   ;;  %v1642_v62 = vcombine.low %v1567_v59, %v1568_v45 }
 0x1aa   : > { %v1570_v7 = vsel %vm1520_vm11, %v1493_v58, 0.0  ;;  %v1584_v24 = vunpack.c.l.s4 %v2603_v11  ;;  %v1579_v60 = vcombine.low %v1555_v26, %v1556_v22  ;;  %v1580_v43 = vcombine.low %v1557_v9, %v1558_v46 }
 0x1ab   : > { %v1643_v47 = vcombine.low %v1569_v37, %v1570_v7  ;;  %v1581_v14 = vcombine.low %v1559_v57, %v1560_v28  ;;  %v1582_v21 = vcombine.low %v1561_v51, %v1562_v2 }
 0x1ac   : > { %v1585_v55 = vunpack.c.0.s8 %v1584_v24 }
 0x1ae   : > { %v1588_v39 = vsub.s32 %v1585_v55, %v3474_v15 }
 0x1b0   : > { %v1589_v4 = vrot.slane %v1579_v60, %v1588_v39  ;;  %v1596_v30 = vrot.slane %v1580_v43, %v1588_v39  ;;  %v1603_v31 = vrot.slane %v1581_v14, %v1588_v39  ;;  %v1610_v56 = vrot.slane %v1582_v21, %v1588_v39 }
 0x1b1   : > { %v1650_v35 = vrot.slane %v1640_v32, %v1588_v39  ;;  %v1657_v0 = vrot.slane %v1641_v13, %v1588_v39  ;;  %v1664_v16 = vrot.slane %v1642_v62, %v1588_v39  ;;  %v1671_v41 = vrot.slane %v1643_v47, %v1588_v39 }
 0x1b2   : > { %v1611_v49 = vcombine.low %v1589_v4, %v1596_v30  ;;  %v1612_v17 = vcombine.low %v1603_v31, %v1610_v56 }
 0x1b3   : > { %v1672_v40 = vcombine.low %v1650_v35, %v1657_v0  ;;  %v1673_v1 = vcombine.low %v1664_v16, %v1671_v41 }
 0x1b4   : > { %v1619_v53 = vrot.slane %v1611_v49, %v1588_v39  ;;  %v1626_v8 = vrot.slane %v1612_v17, %v1588_v39 }
 0x1b5   : > { %v1680_v23 = vrot.slane %v1672_v40, %v1588_v39  ;;  %v1687_v42 = vrot.slane %v1673_v1, %v1588_v39 }
 0x1b6   : > { %v1627_v29 = vcombine.low %v1619_v53, %v1626_v8 }
 0x1b7   : > { %v1688_v52 = vcombine.low %v1680_v23, %v1687_v42 }
 0x1b8   : > { %1631 = vst [vmem:[%s1630_s15] sm:$0xff] %v1627_v29 }
 0x1b9   : > { %1691 = vst [vmem:[%s1690_s6] sm:$0xff] %v1688_v52 }
 0x1fe   : > { %1695 = sbr.rel (%p2034_p2) target bundleno = 518 (0x206), region = 102 }
 0x201   : > { %v1554_v38 = vpop.xlane.xlu0 %1553 }
 0x202   : > { %v1537_v26 = vpop.xlane.xlu1 %1536 }
 0x203   : > { %vm1696_vm0 = vcmask 0   ;;  %v2604_v44 = vmov 0.0   ;;  %v2605_v25 = vmov inf   ;;  %v2606_v22 = vmov -inf  }
 0x204   : > { %1697 = vst.msk [vmem:[%s3857_s21] sm:$0x1] %vm1696_vm0, %v2604_v44  ;;  %1698 = vst.msk [vmem:[#allocation4] sm:$0x1] %vm1696_vm0, %v2605_v25 }
 0x205   : > { %1699 = vst.msk [vmem:[#allocation5] sm:$0x1] %vm1696_vm0, %v2606_v22 }
 0x206 PF: > { %vm1702_vm7 = vcmask 0   ;;  %p2035_p3 = scmp.ne.s32.totalorder %s2510_s14, 1 }
 0x207   : > { %s3985_s7 = smov (!%p2035_p3), 0  }
 0x20b   : > { %v1700_v6 = vld [vmem:[#allocation4] sm:$0x1]  ;;  %1710 = sbr.rel (%p2035_p3) target bundleno = 935 (0x3a7), region = 106 }
 0x20c   : > { %v1704_v50 = vld [vmem:[#allocation5] sm:$0x1]  ;;  %v1701_v9 = vmin.f32 %v1700_v6, %v1537_v26 }
 0x20d   : > { %v1705_v3 = vmax.f32 %v1704_v50, %v1554_v38 }
 0x20e   : > { %1703 = vst.msk [vmem:[#allocation4] sm:$0x1] %vm1702_vm7, %v1701_v9 }
 0x20f   : > { %1706 = vst.msk [vmem:[#allocation5] sm:$0x1] %vm1702_vm7, %v1705_v3 }
 0x210   : > { %v2592_v54 = vmov 0.0  }
 0x215   : > { %v1711_v63 = vld [vmem:[#allocation4] sm:$0x1] }
 0x216   : > { %v1712_v46 = vld [vmem:[#allocation5] sm:$0x1] }
 0x217   : > { %v1713_v5 = vsub.f32 %v1712_v46, %v1711_v63  ;;  %2393 = vrcp.f32 %v1712_v46 }
 0x219   : > { %v1714_v27 = vmul.f32 0.7, %v1713_v5 }
 0x21b   : > { %v1715_v19 = vadd.f32 %v1714_v27, %v1711_v63 }
 0x224   : > { %v2394_v18 = vpop.eup %2393 }
 0x225 LB: >> { %v2607_v34 = vmov 0   ;;  %s2036_s14 = sshll.u32 %s2598_s7, 3  ;;  %v4233_v59 = vld [vmem:[#allocation31_spill] sm:$0xff]  ;;  %s1723_s7 = sadd.s32 1, %s2598_s7   ;;  %s2598_s7 = sphi %s3985_s7, %s1723_s7   ;;  %v2594_v54 = vphi %v2592_v54, %v2593_v54  }
 0x226   : >> { %2395 = vset.pattern.permute.xlu0 %v2607_v34  ;;  %s1726_s10 = scalar_lea.vmem [#allocation2], %s2036_s14  ;;  %s1753_s28 = scalar_lea.vmem [#allocation3], %s2036_s14 }
 0x227   : >> { %1730 = vperm.xlu0 %2395, %v2394_v18   ;;  %v1727_v10 = vld [vmem:[%s1726_s10] sm:$0xff]  ;;  %p1720_p4 = scmp.ge.s32.totalorder %s1723_s7, 2  }
 0x228   : >> { %v1754_v51 = vld [vmem:[%s1753_s28] sm:$0xff]  ;;  %v4235_v7 = vsub.s32 (%p1720_p4), 1, %v3474_v15  ;;  %v4236_v24 = vsub.s32 (%p1720_p4), 2, %v3474_v15  ;;  %v4237_v60 = vsub.s32 (%p1720_p4), 3, %v3474_v15  ;;  %vm1798_vm12 = vcmask (%p1720_p4), 1040384  }
 0x229   : > { %v4234_v32 = vld [vmem:[#allocation31_spill] sm:$0xff] (%p1720_p4)  ;;  %v4238_v43 = vsub.s32 (%p1720_p4), 4, %v3474_v15  ;;  %v4239_v30 = vsub.s32 (%p1720_p4), 5, %v3474_v15  ;;  %v4240_v0 = vsub.s32 (%p1720_p4), 6, %v3474_v15  ;;  %v4241_v17 = vsub.s32 (%p1720_p4), 7, %v3474_v15 }
 0x22b   : >> { %1744 = vperm.xlu0 %2395, %v1715_v19  }
 0x2a2   : >> { %v1731_v57 = vpop.permute.xlu0 %1730 }
 0x2a3   : >> { %v1736_v48 = vrot.slane %v1731_v57, %v4233_v59 }
 0x2a5   : >> { %v1737_v45 = vmul.f32 %v1736_v48, %v1727_v10 }
 0x2a6   : >> { %v1745_v12 = vpop.permute.xlu0 %1744 }
 0x2a7   : >> { %v1738_v58 = vadd.f32 2.718, %v1737_v45  ;;  %v1750_v61 = vrot.slane %v1745_v12, %v4233_v59 }
 0x2a9   : >> { %2396 = vlog2.f32 %v1738_v58  ;;  %vm1751_vm9 = vcmp.le.f32.partialorder %v1727_v10, %v1750_v61 }
 0x2b6   : >> { %v2397_v33 = vpop.eup %2396 }
 0x2b7   : >> { %v1740_v28 = vmul.f32 0.6931472, %v2397_v33 }
 0x2b9   : >> { %2398 = vrcp.f32 %v1740_v28 }
 0x2c6   : >> { %v2399_v37 = vpop.eup %2398 }
 0x2c7   : >> { %v1752_v20 = vsel %vm1751_vm9, %v2399_v37, 0.0 }
 0x2c8   : >> { %v1755_v36 = vmul.f32 %v1754_v51, %v1752_v20  ;;  %1722 = sbr.rel (!%p1720_p4) target bundleno = 549 (0x225), region = 217 }
 0x2ca   : >> { %v1756_v2 = vadd.f32 %v2594_v54, %v1755_v36  }
 0x2cc   : >> { %v2593_v54 = vmov %v1756_v2   ;;  %v1761_v13 = vrot.slane (%p1720_p4), %v1756_v2, %v4234_v32  ;;  %v1765_v11 = vrot.slane (%p1720_p4), %v1756_v2, %v4235_v7  ;;  %v1769_v62 = vrot.slane (%p1720_p4), %v1756_v2, %v4236_v24 }
 0x2cd   : > { %v1773_v47 = vrot.slane %v1756_v2, %v4237_v60  ;;  %v1777_v14 = vrot.slane %v1756_v2, %v4238_v43  ;;  %v1781_v31 = vrot.slane %v1756_v2, %v4239_v30  ;;  %v1785_v16 = vrot.slane %v1756_v2, %v4240_v0 }
 0x2ce   : > { %v1799_v21 = vsel %vm1798_vm12, %v1761_v13, 0.0  ;;  %v1800_v55 = vsel %vm1798_vm12, %v1765_v11, 0.0  ;;  %v1802_v39 = vsel %vm1798_vm12, %v1769_v62, 0.0  ;;  %v1789_v40 = vrot.slane %v1756_v2, %v4241_v17 }
 0x2cf   : > { %v1801_v4 = vadd.f32 %v1800_v55, %v1799_v21  ;;  %v1804_v56 = vsel %vm1798_vm12, %v1773_v47, 0.0  ;;  %v1806_v41 = vsel %vm1798_vm12, %v1777_v14, 0.0  ;;  %v1808_v1 = vsel %vm1798_vm12, %v1781_v31, 0.0 }
 0x2d0   : > { %v1810_v8 = vsel %vm1798_vm12, %v1785_v16, 0.0  ;;  %v1812_v42 = vsel %vm1798_vm12, %v1789_v40, 0.0 }
 0x2d1   : > { %v1803_v35 = vadd.f32 %v1802_v39, %v1801_v4 }
 0x2d3   : > { %v1805_v49 = vadd.f32 %v1804_v56, %v1803_v35 }
 0x2d5   : > { %v1807_v53 = vadd.f32 %v1806_v41, %v1805_v49 }
 0x2d7   : > { %v1809_v23 = vadd.f32 %v1808_v1, %v1807_v53 }
 0x2d9   : > { %v1811_v29 = vadd.f32 %v1810_v8, %v1809_v23 }
 0x2db   : > { %v1813_v52 = vadd.f32 %v1812_v42, %v1811_v29 }
 0x2dd   : > { %1814 = vadd.xlane.f32.xlu0 %v1813_v52 }
 0x366   : > { %v1815_v38 = vpop.xlane.xlu0 %1814 }
 0x367   : > { %v1816_v26 = vrot.slane %v1815_v38, 4 }
 0x369   : > { %v1817_v44 = vadd.f32 %v1816_v26, %v1815_v38 }
 0x36b   : > { %v1818_v25 = vrot.slane %v1817_v44, 2 }
 0x36d   : > { %v1819_v22 = vadd.f32 %v1818_v25, %v1817_v44 }
 0x36f   : > { %v1820_v6 = vrot.slane %v1819_v22, 1 }
 0x371   : > { %v1821_v15 = vadd.f32 %v1820_v6, %v1819_v22 }
 0x373   : > { %2043 = vpush %v1821_v15 }
 0x3a4   : > { %s2044_s9 = spop %2043 }
 0x3a5   : > { %v1823_v50 = vstv %s2044_s9 }
 0x3a6   : > { %1824 = vst.msk [vmem:[%s3857_s21] sm:$0x1] %vm1702_vm7, %v1823_v50 }
 0x3a7 PF: > { %s13_s18 = sadd.s32 1, %s2526_s18   ;;  %s4242_s11 = sld [smem:[#allocation7_spill]] }
 0x3a8   : > { %p10_p5 = scmp.ge.s32.totalorder %s13_s18, 6   ;;  %s4243_s12 = smov %s2506_s13 }
 0x3a9   : > { %s4244_s13 = smov %s2679_s25  ;;  %s4245_s14 = smov %s2518_s16 }
 0x3aa   : > { %s4246_s15 = smov %s2522_s17  ;;  %s4247_s16 = smov %s4250_s19 }
 0x3ab   :  { %12 = sbr.rel (!%p10_p5) target bundleno = 6 (0x6), region = 228 }
 0x3ad   : > { %s4248_s17 = smov %s4242_s11 }

</bundles_post_ra>
